<compile_context>
chip_gen: v6e
topology: v6e:2x2x1
jax: 0.10.0
libtpu: 0.0.40
codegen_flags: <defaults>
</compile_context>

<pallas_src>
import functools

import jax
import jax.numpy as jnp
from jax.experimental import pallas as pl
from jax.experimental.pallas import tpu as pltpu


# ----------------------------- in-kernel helpers -----------------------------

def _layernorm_2d(x2, gamma, beta, eps=1e-5):
    # x2: (M, D); gamma/beta: (1, D).  PyTorch nn.LayerNorm default eps=1e-5.
    mu = jnp.mean(x2, axis=-1, keepdims=True)
    var = jnp.mean(jnp.square(x2 - mu), axis=-1, keepdims=True)
    return (x2 - mu) * jax.lax.rsqrt(var + eps) * gamma + beta


def _erf(x):
    # Abramowitz & Stegun 7.1.26 (|error| <= 1.5e-7).  Uses only
    # exp/mul/add/div/where so it lowers on the VPU/EUP.
    a1, a2, a3, a4, a5 = (0.254829592, -0.284496736, 1.421413741,
                          -1.453152027, 1.061405429)
    p = 0.3275911
    sgn = jnp.where(x < 0.0, -1.0, 1.0)
    ax = jnp.abs(x)
    t = 1.0 / (1.0 + p * ax)
    poly = ((((a5 * t + a4) * t + a3) * t + a2) * t + a1) * t
    return sgn * (1.0 - poly * jnp.exp(-ax * ax))


def _gelu_exact(x):
    # nn.GELU() exact erf form.
    return 0.5 * x * (1.0 + _erf(x * (2.0 ** -0.5)))


# ------------------------------- fused kernel --------------------------------

def transformer_kernel(x_ref,
                       ln1_g_ref, ln1_b_ref, wqkv_ref, wout_ref, bout_ref,
                       ln2_g_ref, ln2_b_ref, w1_ref, b1_ref, w2_ref, b2_ref,
                       o_ref, *, heads, dim_head, scale):
    """One transformer layer per grid step; o_ref is the VMEM-resident carry."""
    layer = pl.program_id(0)

    # First layer: bring the activation into the resident output block.
    @pl.when(layer == 0)
    def _():
        o_ref[...] = x_ref[...]

    x3 = o_ref[...].astype(jnp.float32)               # (B, N, D), VMEM-resident
    B, N, D = x3.shape
    BN = B * N
    dh = dim_head
    inner = heads * dh
    wdt = wqkv_ref.dtype                               # matmul / streaming dtype

    x2 = x3.reshape(BN, D)                             # real M for every matmul

    # ------------------- Residual(PreNorm(Attention)) -------------------
    xn = _layernorm_2d(x2, ln1_g_ref[0], ln1_b_ref[0]).astype(wdt)
    # q/k/v from weight-ref slices (free static slices); single 2-D matmuls.
    q2 = jnp.dot(xn, wqkv_ref[0, :, 0 * inner:1 * inner],
                 preferred_element_type=jnp.float32) * scale   # scale folded in q
    k2 = jnp.dot(xn, wqkv_ref[0, :, 1 * inner:2 * inner],
                 preferred_element_type=jnp.float32)
    v2 = jnp.dot(xn, wqkv_ref[0, :, 2 * inner:3 * inner],
                 preferred_element_type=jnp.float32)

    # Fold (batch, head) into a single einsum batch axis Z = heads*B so the
    # whole attention core is two 3-D contractions instead of a per-head loop.
    def to_heads(t2):                                  # (BN, inner) -> (Z, N, dh)
        return jnp.concatenate(
            [t2[:, h * dh:(h + 1) * dh].reshape(B, N, dh) for h in range(heads)],
            axis=0)

    q3, k3, v3 = to_heads(q2), to_heads(k2), to_heads(v2)
    dots = jnp.einsum('znd,zmd->znm', q3, k3,
                      preferred_element_type=jnp.float32)       # (Z, N, N)
    dots = dots - jnp.max(dots, axis=-1, keepdims=True)
    p = jnp.exp(dots)
    p = p / jnp.sum(p, axis=-1, keepdims=True)                  # exact softmax
    o3 = jnp.einsum('znm,zmd->znd', p, v3,
                    preferred_element_type=jnp.float32)         # (Z, N, dh)

    # Output projection: accumulate per-head against (dh, D) weight-ref slices,
    # which folds heads back without a lane-dim concatenate.
    att = None
    for h in range(heads):
        oh = o3[h * B:(h + 1) * B].reshape(BN, dh).astype(wdt)
        contrib = jnp.dot(oh, wout_ref[0, h * dh:(h + 1) * dh, :],
                          preferred_element_type=jnp.float32)
        att = contrib if att is None else att + contrib
    x2 = x2 + att + bout_ref[0]                        # residual (+ to_out bias)

    # ------------------ Residual(PreNorm(FeedForward)) ------------------
    xn2 = _layernorm_2d(x2, ln2_g_ref[0], ln2_b_ref[0]).astype(wdt)
    h1 = jnp.dot(xn2, w1_ref[0], preferred_element_type=jnp.float32) + b1_ref[0]
    h1 = _gelu_exact(h1).astype(wdt)
    y = jnp.dot(h1, w2_ref[0], preferred_element_type=jnp.float32) + b2_ref[0]
    x2 = x2 + y                                        # residual

    # Carry stays resident in o_ref; HBM writeback happens once at the end
    # (constant output block index across the "arbitrary" depth axis).
    o_ref[...] = x2.reshape(B, N, D).astype(o_ref.dtype)


# ------------------------------ pallas_call glue ------------------------------

def transformer_forward(x, params, *, heads, dim_head):
    """params: dict of per-layer weights stacked along a leading `depth` axis."""
    B, N, D = x.shape
    depth = params["wqkv"].shape[0]
    inner = heads * dim_head
    assert params["wqkv"].shape == (depth, D, 3 * inner)
    scale = D ** (-0.5)        # NB: the reference Attention scales by dim (not dim_head)

    kernel = functools.partial(transformer_kernel, heads=heads,
                               dim_head=dim_head, scale=scale)

    def per_layer_spec(arr):
        tail = tuple(arr.shape[1:])
        zeros = (0,) * len(tail)
        return pl.BlockSpec((1,) + tail, lambda l, _z=zeros: (l,) + _z)

    names = ("ln1_g", "ln1_b", "wqkv", "wout", "bout",
             "ln2_g", "ln2_b", "w1", "b1", "w2", "b2")
    weight_args = [params[n] for n in names]

    # TODO(synk): on v7x (2 TensorCores) a leading "parallel" batch-tile grid
    # axis (gated on pltpu.get_tpu_info()) could engage the second core.
    # TODO(synk): for D not a multiple of 128, a wrapper-side lane-dense
    # reshape of x/out would remove masked partial stores (minor at this size).
    return pl.pallas_call(
        kernel,
        out_shape=jax.ShapeDtypeStruct((B, N, D), x.dtype),
        grid=(depth,),                                            # one layer / step
        in_specs=[pl.BlockSpec((B, N, D), lambda l: (0, 0, 0))]   # x: fetched once
                 + [per_layer_spec(w) for w in weight_args],
        out_specs=pl.BlockSpec((B, N, D), lambda l: (0, 0, 0)),   # resident carry
        compiler_params=pltpu.CompilerParams(
            dimension_semantics=("arbitrary",),                   # layers sequential
            vmem_limit_bytes=64 * 1024 * 1024),
    )(x, *weight_args)


# --------------------------------- parameters ---------------------------------

def init_params(key, *, dim, depth, heads, dim_head, mlp_dim,
                weight_dtype=jnp.float32):
    """Synthetic parameters stacked along a leading depth axis.

    weight_dtype=jnp.bfloat16 halves the weight-streaming DMA and the
    double-buffered VMEM footprint (recommended at real model dims);
    float32 keeps exact parity with the PyTorch reference.
    """
    inner = heads * dim_head
    ks = jax.random.split(key, 6)
    wd = weight_dtype
    return dict(
        # PreNorm(Attention)
        ln1_g=jnp.ones((depth, 1, dim), jnp.float32),
        ln1_b=jnp.zeros((depth, 1, dim), jnp.float32),
        wqkv=(0.02 * jax.random.normal(ks[0], (depth, dim, 3 * inner))).astype(wd),
        wout=(0.02 * jax.random.normal(ks[1], (depth, inner, dim))).astype(wd),
        bout=(0.02 * jax.random.normal(ks[2], (depth, 1, dim))).astype(jnp.float32),
        # PreNorm(FeedForward)
        ln2_g=jnp.ones((depth, 1, dim), jnp.float32),
        ln2_b=jnp.zeros((depth, 1, dim), jnp.float32),
        w1=(0.02 * jax.random.normal(ks[3], (depth, dim, mlp_dim))).astype(wd),
        b1=(0.02 * jax.random.normal(ks[4], (depth, 1, mlp_dim))).astype(jnp.float32),
        w2=(0.02 * jax.random.normal(ks[5], (depth, mlp_dim, dim))).astype(wd),
        b2=jnp.zeros((depth, 1, dim), jnp.float32),
    )
    # NOTE: the unused `Non{i} = nn.Linear(2048, 2048)` modules never appear in
    # forward(), so no parameters are created for them.


# ------------------------------ pure-JAX reference -----------------------------

def transformer_reference(x, params, *, heads, dim_head):
    """Straightforward JAX transcription of the PyTorch forward pass."""
    B, N, D = x.shape
    depth = params["wqkv"].shape[0]
    inner = heads * dim_head
    scale = D ** (-0.5)

    def ln(t, g, b, eps=1e-5):
        mu = t.mean(-1, keepdims=True)
        var = ((t - mu) ** 2).mean(-1, keepdims=True)
        return (t - mu) / jnp.sqrt(var + eps) * g + b

    x = x.astype(jnp.float32)
    for l in range(depth):
        xn = ln(x, params["ln1_g"][l], params["ln1_b"][l])
        qkv = xn @ params["wqkv"][l].astype(jnp.float32)
        q, k, v = jnp.split(qkv, 3, axis=-1)
        sh = lambda t: t.reshape(B, N, heads, dim_head).transpose(0, 2, 1, 3)
        q, k, v = sh(q), sh(k), sh(v)
        dots = jnp.einsum('bhid,bhjd->bhij', q, k) * scale
        attn = jax.nn.softmax(dots, axis=-1)
        out = jnp.einsum('bhij,bhjd->bhid', attn, v)
        out = out.transpose(0, 2, 1, 3).reshape(B, N, inner)
        out = out @ params["wout"][l].astype(jnp.float32) + params["bout"][l]
        x = out + x
        xn = ln(x, params["ln2_g"][l], params["ln2_b"][l])
        h1 = jax.nn.gelu(xn @ params["w1"][l].astype(jnp.float32) + params["b1"][l],
                         approximate=False)
        y = h1 @ params["w2"][l].astype(jnp.float32) + params["b2"][l]
        x = y + x
    return x


# ------------------------------------ main ------------------------------------

if __name__ == "__main__":
    B, N = 2, 8
    dim, depth, heads, dim_head, mlp_dim = 32, 2, 4, 8, 64

    key = jax.random.PRNGKey(0)
    kx, kp = jax.random.split(key)
    x = jax.random.normal(kx, (B, N, dim), jnp.float32)
    # weight_dtype=jnp.bfloat16 is the recommended production setting; f32 is
    # used here so the result matches the PyTorch-equivalent reference tightly.
    params = init_params(kp, dim=dim, depth=depth, heads=heads,
                         dim_head=dim_head, mlp_dim=mlp_dim,
                         weight_dtype=jnp.float32)

    out = transformer_forward(x, params, heads=heads, dim_head=dim_head)
    out = jax.block_until_ready(out)
    assert out.shape == (B, N, dim)
    assert bool(jnp.all(jnp.isfinite(out)))

    ref = transformer_reference(x, params, heads=heads, dim_head=dim_head)
    max_err = float(jnp.max(jnp.abs(out - ref)))
    assert max_err < 2e-3, f"mismatch vs reference: max|err|={max_err}"

    print("KERNEL_OK")
</pallas_src>

<mosaic_0001>
module attributes {stable_mosaic.version = 11 : i64} {
  func.func @transformer_kernel(%arg0: i32, %arg1: memref<2x8x32xf32, #tpu.memory_space<vmem>>, %arg2: memref<1x1x32xf32, #tpu.memory_space<vmem>>, %arg3: memref<1x1x32xf32, #tpu.memory_space<vmem>>, %arg4: memref<1x32x96xf32, #tpu.memory_space<vmem>>, %arg5: memref<1x32x32xf32, #tpu.memory_space<vmem>>, %arg6: memref<1x1x32xf32, #tpu.memory_space<vmem>>, %arg7: memref<1x1x32xf32, #tpu.memory_space<vmem>>, %arg8: memref<1x1x32xf32, #tpu.memory_space<vmem>>, %arg9: memref<1x32x64xf32, #tpu.memory_space<vmem>>, %arg10: memref<1x1x64xf32, #tpu.memory_space<vmem>>, %arg11: memref<1x64x32xf32, #tpu.memory_space<vmem>>, %arg12: memref<1x1x32xf32, #tpu.memory_space<vmem>>, %arg13: memref<2x8x32xf32, #tpu.memory_space<vmem>>) attributes {dimension_semantics = [#tpu.dimension_semantics<arbitrary>], iteration_bounds = array<i64: 2>, scalar_prefetch = 0 : i64, scratch_operands = 0 : i64, tpu.core_type = #tpu.core_type<tc>, window_params = [{pipeline_mode = #tpu.pipeline_mode<synchronous>, transform_indices = @transform_0, window_bounds = array<i64: 2, 8, 32>}, {transform_indices = @transform_1, window_bounds = array<i64: 1, 1, 32>}, {transform_indices = @transform_2, window_bounds = array<i64: 1, 1, 32>}, {transform_indices = @transform_3, window_bounds = array<i64: 1, 32, 96>}, {transform_indices = @transform_4, window_bounds = array<i64: 1, 32, 32>}, {transform_indices = @transform_5, window_bounds = array<i64: 1, 1, 32>}, {transform_indices = @transform_6, window_bounds = array<i64: 1, 1, 32>}, {transform_indices = @transform_7, window_bounds = array<i64: 1, 1, 32>}, {transform_indices = @transform_8, window_bounds = array<i64: 1, 32, 64>}, {transform_indices = @transform_9, window_bounds = array<i64: 1, 1, 64>}, {transform_indices = @transform_10, window_bounds = array<i64: 1, 64, 32>}, {transform_indices = @transform_11, window_bounds = array<i64: 1, 1, 32>}, {pipeline_mode = #tpu.pipeline_mode<synchronous>, transform_indices = @transform_12, window_bounds = array<i64: 2, 8, 32>}]} {
    %c0_i32 = arith.constant 0 : i32
    %0 = arith.cmpi eq, %arg0, %c0_i32 : i32
    %1 = arith.extui %0 : i1 to i32
    %c0_i32_0 = arith.constant 0 : i32
    %2 = arith.cmpi ne, %1, %c0_i32_0 : i32
    scf.if %2 {
      %c0_88 = arith.constant 0 : index
      %c0_89 = arith.constant 0 : index
      %c0_90 = arith.constant 0 : index
      %192 = vector.load %arg1[%c0_88, %c0_89, %c0_90] : memref<2x8x32xf32, #tpu.memory_space<vmem>>, vector<2x8x32xf32>
      %c0_91 = arith.constant 0 : index
      %c0_92 = arith.constant 0 : index
      %c0_93 = arith.constant 0 : index
      %193 = vector.load %arg13[%c0_91, %c0_92, %c0_93] : memref<2x8x32xf32, #tpu.memory_space<vmem>>, vector<2x8x32xf32>
      tpu.vector_store %arg13[%c0_91, %c0_92, %c0_93], %192 {strides = array<i32>} : memref<2x8x32xf32, #tpu.memory_space<vmem>>, vector<2x8x32xf32>,
    } else {
    }
    %c0 = arith.constant 0 : index
    %c0_1 = arith.constant 0 : index
    %c0_2 = arith.constant 0 : index
    %3 = vector.load %arg13[%c0, %c0_1, %c0_2] : memref<2x8x32xf32, #tpu.memory_space<vmem>>, vector<2x8x32xf32>
    %4 = vector.shape_cast %3 : vector<2x8x32xf32> to vector<16x32xf32>
    %c0_3 = arith.constant 0 : index
    %c0_4 = arith.constant 0 : index
    %c0_5 = arith.constant 0 : index
    %5 = vector.load %arg2[%c0_3, %c0_4, %c0_5] : memref<1x1x32xf32, #tpu.memory_space<vmem>>, vector<1x1x32xf32>
    %6 = vector.shape_cast %5 : vector<1x1x32xf32> to vector<1x32xf32>
    %c0_6 = arith.constant 0 : index
    %c0_7 = arith.constant 0 : index
    %c0_8 = arith.constant 0 : index
    %7 = vector.load %arg3[%c0_6, %c0_7, %c0_8] : memref<1x1x32xf32, #tpu.memory_space<vmem>>, vector<1x1x32xf32>
    %8 = vector.shape_cast %7 : vector<1x1x32xf32> to vector<1x32xf32>
    %cst = arith.constant dense<0.000000e+00> : vector<16xf32>
    %9 = vector.multi_reduction <add>, %4, %cst [1] : vector<16x32xf32> to vector<16xf32>
    %10 = vector.shape_cast %9 : vector<16xf32> to vector<16x1xf32>
    %cst_9 = arith.constant 3.200000e+01 : f32
    %11 = vector.broadcast %cst_9 : f32 to vector<16x1xf32>
    %12 = arith.divf %10, %11 : vector<16x1xf32>
    %13 = vector.broadcast %12 : vector<16x1xf32> to vector<16x32xf32>
    %14 = arith.subf %4, %13 : vector<16x32xf32>
    %15 = arith.mulf %14, %14 : vector<16x32xf32>
    %cst_10 = arith.constant dense<0.000000e+00> : vector<16xf32>
    %16 = vector.multi_reduction <add>, %15, %cst_10 [1] : vector<16x32xf32> to vector<16xf32>
    %17 = vector.shape_cast %16 : vector<16xf32> to vector<16x1xf32>
    %cst_11 = arith.constant 3.200000e+01 : f32
    %18 = vector.broadcast %cst_11 : f32 to vector<16x1xf32>
    %19 = arith.divf %17, %18 : vector<16x1xf32>
    %20 = vector.broadcast %12 : vector<16x1xf32> to vector<16x32xf32>
    %21 = arith.subf %4, %20 : vector<16x32xf32>
    %cst_12 = arith.constant 9.99999974E-6 : f32
    %22 = vector.broadcast %cst_12 : f32 to vector<16x1xf32>
    %23 = arith.addf %19, %22 : vector<16x1xf32>
    %24 = math.rsqrt %23 : vector<16x1xf32>
    %25 = vector.broadcast %24 : vector<16x1xf32> to vector<16x32xf32>
    %26 = arith.mulf %21, %25 : vector<16x32xf32>
    %27 = vector.broadcast %6 : vector<1x32xf32> to vector<16x32xf32>
    %28 = arith.mulf %26, %27 : vector<16x32xf32>
    %29 = vector.broadcast %8 : vector<1x32xf32> to vector<16x32xf32>
    %30 = arith.addf %28, %29 : vector<16x32xf32>
    %c0_13 = arith.constant 0 : index
    %c0_14 = arith.constant 0 : index
    %c0_15 = arith.constant 0 : index
    %31 = vector.load %arg4[%c0_13, %c0_14, %c0_15] : memref<1x32x96xf32, #tpu.memory_space<vmem>>, vector<1x32x32xf32>
    %32 = vector.shape_cast %31 : vector<1x32x32xf32> to vector<32x32xf32>
    %cst_16 = arith.constant dense<0.000000e+00> : vector<16x32xf32>
    %33 = tpu.matmul %30, %32, %cst_16 {dimension_numbers = #tpu.dot_dimension_numbers<[1], [0], [0], [1], [0, 0, 1, 1], [], []>} : vector<16x32xf32>, vector<32x32xf32>, vector<16x32xf32> -> vector<16x32xf32>
    %cst_17 = arith.constant 0.176776692 : f32
    %34 = vector.broadcast %cst_17 : f32 to vector<16x32xf32>
    %35 = arith.mulf %33, %34 : vector<16x32xf32>
    %c0_18 = arith.constant 0 : index
    %c0_19 = arith.constant 0 : index
    %c32 = arith.constant 32 : index
    %36 = vector.load %arg4[%c0_18, %c0_19, %c32] : memref<1x32x96xf32, #tpu.memory_space<vmem>>, vector<1x32x32xf32>
    %37 = vector.shape_cast %36 : vector<1x32x32xf32> to vector<32x32xf32>
    %cst_20 = arith.constant dense<0.000000e+00> : vector<16x32xf32>
    %38 = tpu.matmul %30, %37, %cst_20 {dimension_numbers = #tpu.dot_dimension_numbers<[1], [0], [0], [1], [0, 0, 1, 1], [], []>} : vector<16x32xf32>, vector<32x32xf32>, vector<16x32xf32> -> vector<16x32xf32>
    %c0_21 = arith.constant 0 : index
    %c0_22 = arith.constant 0 : index
    %c64 = arith.constant 64 : index
    %39 = vector.load %arg4[%c0_21, %c0_22, %c64] : memref<1x32x96xf32, #tpu.memory_space<vmem>>, vector<1x32x32xf32>
    %40 = vector.shape_cast %39 : vector<1x32x32xf32> to vector<32x32xf32>
    %cst_23 = arith.constant dense<0.000000e+00> : vector<16x32xf32>
    %41 = tpu.matmul %30, %40, %cst_23 {dimension_numbers = #tpu.dot_dimension_numbers<[1], [0], [0], [1], [0, 0, 1, 1], [], []>} : vector<16x32xf32>, vector<32x32xf32>, vector<16x32xf32> -> vector<16x32xf32>
    %42 = vector.extract_strided_slice %35 {offsets = [0, 0], sizes = [16, 8], strides = [1, 1]} : vector<16x32xf32> to vector<16x8xf32>
    %43 = vector.shape_cast %42 : vector<16x8xf32> to vector<2x8x8xf32>
    %44 = vector.extract_strided_slice %35 {offsets = [0, 8], sizes = [16, 8], strides = [1, 1]} : vector<16x32xf32> to vector<16x8xf32>
    %45 = vector.shape_cast %44 : vector<16x8xf32> to vector<2x8x8xf32>
    %46 = vector.extract_strided_slice %35 {offsets = [0, 16], sizes = [16, 8], strides = [1, 1]} : vector<16x32xf32> to vector<16x8xf32>
    %47 = vector.shape_cast %46 : vector<16x8xf32> to vector<2x8x8xf32>
    %48 = vector.extract_strided_slice %35 {offsets = [0, 24], sizes = [16, 8], strides = [1, 1]} : vector<16x32xf32> to vector<16x8xf32>
    %49 = vector.shape_cast %48 : vector<16x8xf32> to vector<2x8x8xf32>
    %50 = tpu.concatenate %43, %45, %47, %49 in 0 : vector<2x8x8xf32>, vector<2x8x8xf32>, vector<2x8x8xf32>, vector<2x8x8xf32> -> vector<8x8x8xf32>
    %51 = vector.extract_strided_slice %38 {offsets = [0, 0], sizes = [16, 8], strides = [1, 1]} : vector<16x32xf32> to vector<16x8xf32>
    %52 = vector.shape_cast %51 : vector<16x8xf32> to vector<2x8x8xf32>
    %53 = vector.extract_strided_slice %38 {offsets = [0, 8], sizes = [16, 8], strides = [1, 1]} : vector<16x32xf32> to vector<16x8xf32>
    %54 = vector.shape_cast %53 : vector<16x8xf32> to vector<2x8x8xf32>
    %55 = vector.extract_strided_slice %38 {offsets = [0, 16], sizes = [16, 8], strides = [1, 1]} : vector<16x32xf32> to vector<16x8xf32>
    %56 = vector.shape_cast %55 : vector<16x8xf32> to vector<2x8x8xf32>
    %57 = vector.extract_strided_slice %38 {offsets = [0, 24], sizes = [16, 8], strides = [1, 1]} : vector<16x32xf32> to vector<16x8xf32>
    %58 = vector.shape_cast %57 : vector<16x8xf32> to vector<2x8x8xf32>
    %59 = tpu.concatenate %52, %54, %56, %58 in 0 : vector<2x8x8xf32>, vector<2x8x8xf32>, vector<2x8x8xf32>, vector<2x8x8xf32> -> vector<8x8x8xf32>
    %60 = vector.extract_strided_slice %41 {offsets = [0, 0], sizes = [16, 8], strides = [1, 1]} : vector<16x32xf32> to vector<16x8xf32>
    %61 = vector.shape_cast %60 : vector<16x8xf32> to vector<2x8x8xf32>
    %62 = vector.extract_strided_slice %41 {offsets = [0, 8], sizes = [16, 8], strides = [1, 1]} : vector<16x32xf32> to vector<16x8xf32>
    %63 = vector.shape_cast %62 : vector<16x8xf32> to vector<2x8x8xf32>
    %64 = vector.extract_strided_slice %41 {offsets = [0, 16], sizes = [16, 8], strides = [1, 1]} : vector<16x32xf32> to vector<16x8xf32>
    %65 = vector.shape_cast %64 : vector<16x8xf32> to vector<2x8x8xf32>
    %66 = vector.extract_strided_slice %41 {offsets = [0, 24], sizes = [16, 8], strides = [1, 1]} : vector<16x32xf32> to vector<16x8xf32>
    %67 = vector.shape_cast %66 : vector<16x8xf32> to vector<2x8x8xf32>
    %68 = tpu.concatenate %61, %63, %65, %67 in 0 : vector<2x8x8xf32>, vector<2x8x8xf32>, vector<2x8x8xf32>, vector<2x8x8xf32> -> vector<8x8x8xf32>
    "tpu.trace_start"() <{level = 10 : i32, message = "znd,zmd->znm"}> : () -> ()
    %cst_24 = arith.constant dense<0.000000e+00> : vector<8x8x8xf32>
    %69 = tpu.matmul %50, %59, %cst_24 {dimension_numbers = #tpu.dot_dimension_numbers<[2], [2], [1], [1], [0, 0, 0, 1, 1, 1], [0], [0]>} : vector<8x8x8xf32>, vector<8x8x8xf32>, vector<8x8x8xf32> -> vector<8x8x8xf32>
    "tpu.trace_stop"() : () -> ()
    %cst_25 = arith.constant dense<0xFF800000> : vector<8x8xf32>
    %70 = vector.multi_reduction <maximumf>, %69, %cst_25 [2] : vector<8x8x8xf32> to vector<8x8xf32>
    %71 = vector.shape_cast %70 : vector<8x8xf32> to vector<8x8x1xf32>
    %72 = vector.broadcast %71 : vector<8x8x1xf32> to vector<8x8x8xf32>
    %73 = arith.subf %69, %72 : vector<8x8x8xf32>
    %74 = math.exp %73 : vector<8x8x8xf32>
    %cst_26 = arith.constant dense<0.000000e+00> : vector<8x8xf32>
    %75 = vector.multi_reduction <add>, %74, %cst_26 [2] : vector<8x8x8xf32> to vector<8x8xf32>
    %76 = vector.shape_cast %75 : vector<8x8xf32> to vector<8x8x1xf32>
    %77 = vector.broadcast %76 : vector<8x8x1xf32> to vector<8x8x8xf32>
    %78 = arith.divf %74, %77 : vector<8x8x8xf32>
    "tpu.trace_start"() <{level = 10 : i32, message = "znm,zmd->znd"}> : () -> ()
    %cst_27 = arith.constant dense<0.000000e+00> : vector<8x8x8xf32>
    %79 = tpu.matmul %78, %68, %cst_27 {dimension_numbers = #tpu.dot_dimension_numbers<[2], [1], [1], [2], [0, 0, 0, 1, 1, 2], [0], [0]>} : vector<8x8x8xf32>, vector<8x8x8xf32>, vector<8x8x8xf32> -> vector<8x8x8xf32>
    "tpu.trace_stop"() : () -> ()
    %80 = vector.extract_strided_slice %79 {offsets = [0, 0, 0], sizes = [2, 8, 8], strides = [1, 1, 1]} : vector<8x8x8xf32> to vector<2x8x8xf32>
    %81 = vector.shape_cast %80 : vector<2x8x8xf32> to vector<16x8xf32>
    %c0_28 = arith.constant 0 : index
    %c0_29 = arith.constant 0 : index
    %c0_30 = arith.constant 0 : index
    %82 = vector.load %arg5[%c0_28, %c0_29, %c0_30] : memref<1x32x32xf32, #tpu.memory_space<vmem>>, vector<1x8x32xf32>
    %83 = vector.shape_cast %82 : vector<1x8x32xf32> to vector<8x32xf32>
    %cst_31 = arith.constant dense<0.000000e+00> : vector<16x32xf32>
    %84 = tpu.matmul %81, %83, %cst_31 {dimension_numbers = #tpu.dot_dimension_numbers<[1], [0], [0], [1], [0, 0, 1, 1], [], []>} : vector<16x8xf32>, vector<8x32xf32>, vector<16x32xf32> -> vector<16x32xf32>
    %85 = vector.extract_strided_slice %79 {offsets = [2, 0, 0], sizes = [2, 8, 8], strides = [1, 1, 1]} : vector<8x8x8xf32> to vector<2x8x8xf32>
    %86 = vector.shape_cast %85 : vector<2x8x8xf32> to vector<16x8xf32>
    %c0_32 = arith.constant 0 : index
    %c8 = arith.constant 8 : index
    %c0_33 = arith.constant 0 : index
    %87 = vector.load %arg5[%c0_32, %c8, %c0_33] : memref<1x32x32xf32, #tpu.memory_space<vmem>>, vector<1x8x32xf32>
    %88 = vector.shape_cast %87 : vector<1x8x32xf32> to vector<8x32xf32>
    %cst_34 = arith.constant dense<0.000000e+00> : vector<16x32xf32>
    %89 = tpu.matmul %86, %88, %cst_34 {dimension_numbers = #tpu.dot_dimension_numbers<[1], [0], [0], [1], [0, 0, 1, 1], [], []>} : vector<16x8xf32>, vector<8x32xf32>, vector<16x32xf32> -> vector<16x32xf32>
    %90 = arith.addf %84, %89 : vector<16x32xf32>
    %91 = vector.extract_strided_slice %79 {offsets = [4, 0, 0], sizes = [2, 8, 8], strides = [1, 1, 1]} : vector<8x8x8xf32> to vector<2x8x8xf32>
    %92 = vector.shape_cast %91 : vector<2x8x8xf32> to vector<16x8xf32>
    %c0_35 = arith.constant 0 : index
    %c16 = arith.constant 16 : index
    %c0_36 = arith.constant 0 : index
    %93 = vector.load %arg5[%c0_35, %c16, %c0_36] : memref<1x32x32xf32, #tpu.memory_space<vmem>>, vector<1x8x32xf32>
    %94 = vector.shape_cast %93 : vector<1x8x32xf32> to vector<8x32xf32>
    %cst_37 = arith.constant dense<0.000000e+00> : vector<16x32xf32>
    %95 = tpu.matmul %92, %94, %cst_37 {dimension_numbers = #tpu.dot_dimension_numbers<[1], [0], [0], [1], [0, 0, 1, 1], [], []>} : vector<16x8xf32>, vector<8x32xf32>, vector<16x32xf32> -> vector<16x32xf32>
    %96 = arith.addf %90, %95 : vector<16x32xf32>
    %97 = vector.extract_strided_slice %79 {offsets = [6, 0, 0], sizes = [2, 8, 8], strides = [1, 1, 1]} : vector<8x8x8xf32> to vector<2x8x8xf32>
    %98 = vector.shape_cast %97 : vector<2x8x8xf32> to vector<16x8xf32>
    %c0_38 = arith.constant 0 : index
    %c24 = arith.constant 24 : index
    %c0_39 = arith.constant 0 : index
    %99 = vector.load %arg5[%c0_38, %c24, %c0_39] : memref<1x32x32xf32, #tpu.memory_space<vmem>>, vector<1x8x32xf32>
    %100 = vector.shape_cast %99 : vector<1x8x32xf32> to vector<8x32xf32>
    %cst_40 = arith.constant dense<0.000000e+00> : vector<16x32xf32>
    %101 = tpu.matmul %98, %100, %cst_40 {dimension_numbers = #tpu.dot_dimension_numbers<[1], [0], [0], [1], [0, 0, 1, 1], [], []>} : vector<16x8xf32>, vector<8x32xf32>, vector<16x32xf32> -> vector<16x32xf32>
    %102 = arith.addf %96, %101 : vector<16x32xf32>
    %103 = arith.addf %4, %102 : vector<16x32xf32>
    %c0_41 = arith.constant 0 : index
    %c0_42 = arith.constant 0 : index
    %c0_43 = arith.constant 0 : index
    %104 = vector.load %arg6[%c0_41, %c0_42, %c0_43] : memref<1x1x32xf32, #tpu.memory_space<vmem>>, vector<1x1x32xf32>
    %105 = vector.shape_cast %104 : vector<1x1x32xf32> to vector<1x32xf32>
    %106 = vector.broadcast %105 : vector<1x32xf32> to vector<16x32xf32>
    %107 = arith.addf %103, %106 : vector<16x32xf32>
    %c0_44 = arith.constant 0 : index
    %c0_45 = arith.constant 0 : index
    %c0_46 = arith.constant 0 : index
    %108 = vector.load %arg7[%c0_44, %c0_45, %c0_46] : memref<1x1x32xf32, #tpu.memory_space<vmem>>, vector<1x1x32xf32>
    %109 = vector.shape_cast %108 : vector<1x1x32xf32> to vector<1x32xf32>
    %c0_47 = arith.constant 0 : index
    %c0_48 = arith.constant 0 : index
    %c0_49 = arith.constant 0 : index
    %110 = vector.load %arg8[%c0_47, %c0_48, %c0_49] : memref<1x1x32xf32, #tpu.memory_space<vmem>>, vector<1x1x32xf32>
    %111 = vector.shape_cast %110 : vector<1x1x32xf32> to vector<1x32xf32>
    %cst_50 = arith.constant dense<0.000000e+00> : vector<16xf32>
    %112 = vector.multi_reduction <add>, %107, %cst_50 [1] : vector<16x32xf32> to vector<16xf32>
    %113 = vector.shape_cast %112 : vector<16xf32> to vector<16x1xf32>
    %cst_51 = arith.constant 3.200000e+01 : f32
    %114 = vector.broadcast %cst_51 : f32 to vector<16x1xf32>
    %115 = arith.divf %113, %114 : vector<16x1xf32>
    %116 = vector.broadcast %115 : vector<16x1xf32> to vector<16x32xf32>
    %117 = arith.subf %107, %116 : vector<16x32xf32>
    %118 = arith.mulf %117, %117 : vector<16x32xf32>
    %cst_52 = arith.constant dense<0.000000e+00> : vector<16xf32>
    %119 = vector.multi_reduction <add>, %118, %cst_52 [1] : vector<16x32xf32> to vector<16xf32>
    %120 = vector.shape_cast %119 : vector<16xf32> to vector<16x1xf32>
    %cst_53 = arith.constant 3.200000e+01 : f32
    %121 = vector.broadcast %cst_53 : f32 to vector<16x1xf32>
    %122 = arith.divf %120, %121 : vector<16x1xf32>
    %123 = vector.broadcast %115 : vector<16x1xf32> to vector<16x32xf32>
    %124 = arith.subf %107, %123 : vector<16x32xf32>
    %cst_54 = arith.constant 9.99999974E-6 : f32
    %125 = vector.broadcast %cst_54 : f32 to vector<16x1xf32>
    %126 = arith.addf %122, %125 : vector<16x1xf32>
    %127 = math.rsqrt %126 : vector<16x1xf32>
    %128 = vector.broadcast %127 : vector<16x1xf32> to vector<16x32xf32>
    %129 = arith.mulf %124, %128 : vector<16x32xf32>
    %130 = vector.broadcast %109 : vector<1x32xf32> to vector<16x32xf32>
    %131 = arith.mulf %129, %130 : vector<16x32xf32>
    %132 = vector.broadcast %111 : vector<1x32xf32> to vector<16x32xf32>
    %133 = arith.addf %131, %132 : vector<16x32xf32>
    %c0_55 = arith.constant 0 : index
    %c0_56 = arith.constant 0 : index
    %c0_57 = arith.constant 0 : index
    %134 = vector.load %arg9[%c0_55, %c0_56, %c0_57] : memref<1x32x64xf32, #tpu.memory_space<vmem>>, vector<1x32x64xf32>
    %135 = vector.shape_cast %134 : vector<1x32x64xf32> to vector<32x64xf32>
    %cst_58 = arith.constant dense<0.000000e+00> : vector<16x64xf32>
    %136 = tpu.matmul %133, %135, %cst_58 {dimension_numbers = #tpu.dot_dimension_numbers<[1], [0], [0], [1], [0, 0, 1, 1], [], []>} : vector<16x32xf32>, vector<32x64xf32>, vector<16x64xf32> -> vector<16x64xf32>
    %c0_59 = arith.constant 0 : index
    %c0_60 = arith.constant 0 : index
    %c0_61 = arith.constant 0 : index
    %137 = vector.load %arg10[%c0_59, %c0_60, %c0_61] : memref<1x1x64xf32, #tpu.memory_space<vmem>>, vector<1x1x64xf32>
    %138 = vector.shape_cast %137 : vector<1x1x64xf32> to vector<1x64xf32>
    %139 = vector.broadcast %138 : vector<1x64xf32> to vector<16x64xf32>
    %140 = arith.addf %136, %139 : vector<16x64xf32>
    %cst_62 = arith.constant 5.000000e-01 : f32
    %141 = vector.broadcast %cst_62 : f32 to vector<16x64xf32>
    %142 = arith.mulf %141, %140 : vector<16x64xf32>
    %cst_63 = arith.constant 0.707106769 : f32
    %143 = vector.broadcast %cst_63 : f32 to vector<16x64xf32>
    %144 = arith.mulf %140, %143 : vector<16x64xf32>
    %cst_64 = arith.constant 0.000000e+00 : f32
    %145 = vector.broadcast %cst_64 : f32 to vector<16x64xf32>
    %146 = arith.cmpf olt, %144, %145 : vector<16x64xf32>
    %cst_65 = arith.constant -1.000000e+00 : f32
    %cst_66 = arith.constant 1.000000e+00 : f32
    %147 = vector.broadcast %cst_65 : f32 to vector<16x64xf32>
    %148 = vector.broadcast %cst_66 : f32 to vector<16x64xf32>
    %149 = arith.select %146, %147, %148 : vector<16x64xi1>, vector<16x64xf32>
    %150 = math.absf %144 : vector<16x64xf32>
    %cst_67 = arith.constant 0.327591091 : f32
    %151 = vector.broadcast %cst_67 : f32 to vector<16x64xf32>
    %152 = arith.mulf %151, %150 : vector<16x64xf32>
    %cst_68 = arith.constant 1.000000e+00 : f32
    %153 = vector.broadcast %cst_68 : f32 to vector<16x64xf32>
    %154 = arith.addf %153, %152 : vector<16x64xf32>
    %cst_69 = arith.constant 1.000000e+00 : f32
    %155 = vector.broadcast %cst_69 : f32 to vector<16x64xf32>
    %156 = arith.divf %155, %154 : vector<16x64xf32>
    %cst_70 = arith.constant 1.06140542 : f32
    %157 = vector.broadcast %cst_70 : f32 to vector<16x64xf32>
    %158 = arith.mulf %157, %156 : vector<16x64xf32>
    %cst_71 = arith.constant -1.45315206 : f32
    %159 = vector.broadcast %cst_71 : f32 to vector<16x64xf32>
    %160 = arith.addf %158, %159 : vector<16x64xf32>
    %161 = arith.mulf %160, %156 : vector<16x64xf32>
    %cst_72 = arith.constant 1.42141378 : f32
    %162 = vector.broadcast %cst_72 : f32 to vector<16x64xf32>
    %163 = arith.addf %161, %162 : vector<16x64xf32>
    %164 = arith.mulf %163, %156 : vector<16x64xf32>
    %cst_73 = arith.constant -0.284496725 : f32
    %165 = vector.broadcast %cst_73 : f32 to vector<16x64xf32>
    %166 = arith.addf %164, %165 : vector<16x64xf32>
    %167 = arith.mulf %166, %156 : vector<16x64xf32>
    %cst_74 = arith.constant 0.254829586 : f32
    %168 = vector.broadcast %cst_74 : f32 to vector<16x64xf32>
    %169 = arith.addf %167, %168 : vector<16x64xf32>
    %170 = arith.mulf %169, %156 : vector<16x64xf32>
    %cst_75 = arith.constant 0.000000e+00 : f32
    %171 = vector.broadcast %cst_75 : f32 to vector<16x64xf32>
    %172 = arith.subf %171, %150 : vector<16x64xf32>
    %173 = arith.mulf %172, %150 : vector<16x64xf32>
    %174 = math.exp %173 : vector<16x64xf32>
    %175 = arith.mulf %170, %174 : vector<16x64xf32>
    %cst_76 = arith.constant 1.000000e+00 : f32
    %176 = vector.broadcast %cst_76 : f32 to vector<16x64xf32>
    %177 = arith.subf %176, %175 : vector<16x64xf32>
    %178 = arith.mulf %149, %177 : vector<16x64xf32>
    %cst_77 = arith.constant 1.000000e+00 : f32
    %179 = vector.broadcast %cst_77 : f32 to vector<16x64xf32>
    %180 = arith.addf %179, %178 : vector<16x64xf32>
    %181 = arith.mulf %142, %180 : vector<16x64xf32>
    %c0_78 = arith.constant 0 : index
    %c0_79 = arith.constant 0 : index
    %c0_80 = arith.constant 0 : index
    %182 = vector.load %arg11[%c0_78, %c0_79, %c0_80] : memref<1x64x32xf32, #tpu.memory_space<vmem>>, vector<1x64x32xf32>
    %183 = vector.shape_cast %182 : vector<1x64x32xf32> to vector<64x32xf32>
    %cst_81 = arith.constant dense<0.000000e+00> : vector<16x32xf32>
    %184 = tpu.matmul %181, %183, %cst_81 {dimension_numbers = #tpu.dot_dimension_numbers<[1], [0], [0], [1], [0, 0, 1, 1], [], []>} : vector<16x64xf32>, vector<64x32xf32>, vector<16x32xf32> -> vector<16x32xf32>
    %c0_82 = arith.constant 0 : index
    %c0_83 = arith.constant 0 : index
    %c0_84 = arith.constant 0 : index
    %185 = vector.load %arg12[%c0_82, %c0_83, %c0_84] : memref<1x1x32xf32, #tpu.memory_space<vmem>>, vector<1x1x32xf32>
    %186 = vector.shape_cast %185 : vector<1x1x32xf32> to vector<1x32xf32>
    %187 = vector.broadcast %186 : vector<1x32xf32> to vector<16x32xf32>
    %188 = arith.addf %184, %187 : vector<16x32xf32>
    %189 = arith.addf %107, %188 : vector<16x32xf32>
    %190 = vector.shape_cast %189 : vector<16x32xf32> to vector<2x8x32xf32>
    %c0_85 = arith.constant 0 : index
    %c0_86 = arith.constant 0 : index
    %c0_87 = arith.constant 0 : index
    %191 = vector.load %arg13[%c0_85, %c0_86, %c0_87] : memref<2x8x32xf32, #tpu.memory_space<vmem>>, vector<2x8x32xf32>
    tpu.vector_store %arg13[%c0_85, %c0_86, %c0_87], %190 {strides = array<i32>} : memref<2x8x32xf32, #tpu.memory_space<vmem>>, vector<2x8x32xf32>,
    return
  }
  func.func @transform_0(%arg0: i32) -> (i32, i32, i32) {
    %c0_i32 = arith.constant 0 : i32
    %c0_i32_0 = arith.constant 0 : i32
    %c0_i32_1 = arith.constant 0 : i32
    %c0_i32_2 = arith.constant 0 : i32
    return %c0_i32, %c0_i32_0, %c0_i32_1 : i32, i32, i32
  }
  func.func @transform_1(%arg0: i32) -> (i32, i32, i32) {
    %c0_i32 = arith.constant 0 : i32
    %c0_i32_0 = arith.constant 0 : i32
    %c0_i32_1 = arith.constant 0 : i32
    return %arg0, %c0_i32, %c0_i32_0 : i32, i32, i32
  }
  func.func @transform_2(%arg0: i32) -> (i32, i32, i32) {
    %c0_i32 = arith.constant 0 : i32
    %c0_i32_0 = arith.constant 0 : i32
    %c0_i32_1 = arith.constant 0 : i32
    return %arg0, %c0_i32, %c0_i32_0 : i32, i32, i32
  }
  func.func @transform_3(%arg0: i32) -> (i32, i32, i32) {
    %c0_i32 = arith.constant 0 : i32
    %c0_i32_0 = arith.constant 0 : i32
    %c0_i32_1 = arith.constant 0 : i32
    return %arg0, %c0_i32, %c0_i32_0 : i32, i32, i32
  }
  func.func @transform_4(%arg0: i32) -> (i32, i32, i32) {
    %c0_i32 = arith.constant 0 : i32
    %c0_i32_0 = arith.constant 0 : i32
    %c0_i32_1 = arith.constant 0 : i32
    return %arg0, %c0_i32, %c0_i32_0 : i32, i32, i32
  }
  func.func @transform_5(%arg0: i32) -> (i32, i32, i32) {
    %c0_i32 = arith.constant 0 : i32
    %c0_i32_0 = arith.constant 0 : i32
    %c0_i32_1 = arith.constant 0 : i32
    return %arg0, %c0_i32, %c0_i32_0 : i32, i32, i32
  }
  func.func @transform_6(%arg0: i32) -> (i32, i32, i32) {
    %c0_i32 = arith.constant 0 : i32
    %c0_i32_0 = arith.constant 0 : i32
    %c0_i32_1 = arith.constant 0 : i32
    return %arg0, %c0_i32, %c0_i32_0 : i32, i32, i32
  }
  func.func @transform_7(%arg0: i32) -> (i32, i32, i32) {
    %c0_i32 = arith.constant 0 : i32
    %c0_i32_0 = arith.constant 0 : i32
    %c0_i32_1 = arith.constant 0 : i32
    return %arg0, %c0_i32, %c0_i32_0 : i32, i32, i32
  }
  func.func @transform_8(%arg0: i32) -> (i32, i32, i32) {
    %c0_i32 = arith.constant 0 : i32
    %c0_i32_0 = arith.constant 0 : i32
    %c0_i32_1 = arith.constant 0 : i32
    return %arg0, %c0_i32, %c0_i32_0 : i32, i32, i32
  }
  func.func @transform_9(%arg0: i32) -> (i32, i32, i32) {
    %c0_i32 = arith.constant 0 : i32
    %c0_i32_0 = arith.constant 0 : i32
    %c0_i32_1 = arith.constant 0 : i32
    return %arg0, %c0_i32, %c0_i32_0 : i32, i32, i32
  }
  func.func @transform_10(%arg0: i32) -> (i32, i32, i32) {
    %c0_i32 = arith.constant 0 : i32
    %c0_i32_0 = arith.constant 0 : i32
    %c0_i32_1 = arith.constant 0 : i32
    return %arg0, %c0_i32, %c0_i32_0 : i32, i32, i32
  }
  func.func @transform_11(%arg0: i32) -> (i32, i32, i32) {
    %c0_i32 = arith.constant 0 : i32
    %c0_i32_0 = arith.constant 0 : i32
    %c0_i32_1 = arith.constant 0 : i32
    return %arg0, %c0_i32, %c0_i32_0 : i32, i32, i32
  }
  func.func @transform_12(%arg0: i32) -> (i32, i32, i32) {
    %c0_i32 = arith.constant 0 : i32
    %c0_i32_0 = arith.constant 0 : i32
    %c0_i32_1 = arith.constant 0 : i32
    %c0_i32_2 = arith.constant 0 : i32
    return %c0_i32, %c0_i32_0, %c0_i32_1 : i32, i32, i32
  }
}

</mosaic_0001>

<bundles_post_ra>
// kernel: tpu_custom_call.1
= control target key start
LH: loop header
LB: loop body
LE: loop exit
PB: predicated region body
PF: predicated region fallthrough
CT: control target
= control target key end

     0   :  { %s4071_s0 = inlined_call_operand.hbm [shape: f32[2,8,32], index: 0, kind: input, shape index: {}]   ;;  %s4072_s1 = inlined_call_operand.hbm [shape: f32[2,1,32], index: 1, kind: input, shape index: {}]   ;;  %s4073_s2 = inlined_call_operand.vmem [shape: f32[2,1,32], index: 2, kind: input, shape index: {}]   ;;  %s4074_s3 = inlined_call_operand.vmem [shape: f32[2,32,96], index: 3, kind: input, shape index: {}]   ;;  %s4075_s4 = inlined_call_operand.vmem [shape: f32[2,32,32], index: 4, kind: input, shape index: {}]   ;;  %s4076_s5 = inlined_call_operand.vmem [shape: f32[2,1,32], index: 5, kind: input, shape index: {}]   ;;  %s4077_s6 = inlined_call_operand.vmem [shape: f32[2,1,32], index: 6, kind: input, shape index: {}]   ;;  %s4078_s7 = inlined_call_operand.vmem [shape: f32[2,1,32], index: 7, kind: input, shape index: {}]   ;;  %s4079_s8 = inlined_call_operand.vmem [shape: f32[2,32,64], index: 8, kind: input, shape index: {}]   ;;  %s4080_s9 = inlined_call_operand.vmem [shape: f32[2,1,64], index: 9, kind: input, shape index: {}]   ;;  %s4081_s10 = inlined_call_operand.vmem [shape: f32[2,64,32], index: 10, kind: input, shape index: {}]   ;;  %s4082_s11 = inlined_call_operand.vmem [shape: f32[2,1,32], index: 11, kind: input, shape index: {}]   ;;  %s4083_s12 = inlined_call_operand.hbm [shape: f32[2,8,32], index: 12, kind: output, shape index: {}]  }
   0x1   :  { %4089 = sst [smem:[#allocation13_spill]] %s4071_s0 }
   0x2   :  { %4090 = sst [smem:[#allocation14_spill]] %s4072_s1 }
   0x3   :  { %4091 = sst [smem:[#allocation15_spill]] %s4074_s3 }
   0x4   :  { %4092 = sst [smem:[#allocation16_spill]] %s4075_s4 }
   0x5   :  { %4093 = sst [smem:[#allocation17_spill]] %s4080_s9 }
   0x6   :  { %4094 = sst [smem:[#allocation18_spill]] %s4081_s10 }
   0x7   :  { %4095 = sst [smem:[#allocation19_spill]] %s4082_s11 }
   0x8   :  { %4096 = sst [smem:[#allocation20_spill]] %s4083_s12 }
   0x9   :  { %17 = vsyncpa [#allocation3], 0 }
   0xa   :  { %18 = vsyncpa [#allocation6], 0 }
   0xb   :  { %20 = vsyncpa [#allocation6 + $0x1], 0 }
   0xc   :  { %21 = vsyncpa [#allocation4], 0  ;;  %s3665_s21 = smov 0   ;;  %s3667_s22 = smov 0  }
   0xd   :  { %s3669_s23 = smov 0   ;;  %s3671_s24 = smov 0  }
   0xe LB: > { %s3684_s25 = sadd.s32 4294967295, %s3583_s24   ;;  %p68_p0 = scmp.ne.s32.totalorder %s3575_s22, %s3571_s21  ;;  %s3583_s24 = sphi %s3671_s24, %s4121_s24   ;;  %s3579_s23 = sphi %s3669_s23, %s4125_s23   ;;  %s3575_s22 = sphi %s3667_s22, %s4124_s22   ;;  %s3571_s21 = sphi %s3665_s21, %s4123_s21  }
   0xf   : > { %p4086_p1 = scmp.eq.s32.totalorder %s3684_s25, 0  ;;  %p3033_p2 = scmp.ge.s32.totalorder %s3583_s24, 1 }
  0x10   : > { %p360_p3 = scmp.lt.s32.totalorder %s3583_s24, 3  ;;  %s3585_s28 = smov [#allocation2]  }
  0x11   : > { %p3693_p5 = por %p4086_p1, %p68_p0  ;;  %s372_s29 = sshll.u32 %s3585_s28, 4  ;;  %s373_s29 = int_to_ptr.vmem [resolvable:$true] %s372_s29 }
  0x12   : > { %p3697_p6 = pnand %p3033_p2, %p360_p3  ;;  %s3710_s13 = sadd.s32 1, %s3583_s24  }
  0x13   : > { %s4097_s26 = scalar_select %p3693_p5, 1, 0 }
  0x14   : > { %s4098_s27 = scalar_select %p3697_p6, 1, 0 }
  0x15   : > { %p3356_p7 = pneg %p3697_p6  ;;  %4100 = sst [smem:[#allocation11_spill]] %s3710_s13 }
  0x16   : > { %s55_s14 = sadd.s32 1, %s3579_s23  ;;  %s52_s15 = ssub.s32 %s3583_s24, %s3710_s13 }
  0x17   : > { %p3705_p8 = pnand %p3356_p7, %p4086_p1  ;;  %s3474_s16 = scalar_lea.vmem %s373_s29, 256 }
  0x18   : > { %p3475_p10 = scmp.ne.s32.totalorder %s373_s29, %s3474_s16  ;;  %p3482_p13 = scmp.lt.s32.totalorder %s373_s29, %s373_s29 }
  0x19   : > { %p3465_p9 = pneg %p3705_p8  ;;  %p3483_p0 = scmp.lt.s32.totalorder %s3474_s16, %s3474_s16 }
  0x1b   : > { %p3477_p11 = pnand %p3475_p10, %p3465_p9  ;;  %p3484_p2 = por %p3483_p0, %p3482_p13 }
  0x1d   : > { %p3478_p12 = pneg %p3477_p11 }
  0x1f   : > { %p3485_p3 = pnand %p3484_p2, %p3478_p12 }
  0x21   : > { %3488 = shalt.err (!%p3485_p3)
}
  0x22   : > { %s3586_s17 = smov 128   ;;  %s3587_s18 = smov 8  }
  0x23   : > { %s4101_s0 = sld [smem:[#allocation13_spill]]  ;;  %p53_p7 = scmp.eq.s32.totalorder %s52_s15, 0 }
  0x24   : > { %p62_p9 = scmp.ne.s32.totalorder %s3579_s23, %s3575_s22  ;;  %p63_p10 = scmp.eq.s32.totalorder %s3583_s24, 0 }
  0x25   : > { %p3365_p11 = scmp.lt.s32.totalorder %s3583_s24, 2  ;;  %s386_s28 = sand.u32 1, %s3579_s23  }
  0x26   : > { %s3727_s21 = scalar_select %p53_p7, %s3579_s23, %s55_s14  }
  0x27   : > { %p64_p12 = por %p63_p10, %p62_p9  ;;  %s3036_s16 = sshll.u32 %s3583_s24, 4 }
  0x28   : > { %4102 = sst [smem:[#allocation12_spill]] %s3727_s21  ;;  %s389_s13 = scalar_lea.vmem [#allocation5], %s386_s28 }
  0x29   : > { %3359 = dma.hbm_to_vmem [thread:$0]  (!%p3705_p8), %s4101_s0, 256, %s373_s29, [#allocation3], %s3586_s17, %s3586_s17, %s3587_s18  }
  0x2a   : > { %s396_s12 = sshll.u32 %s389_s13, 4  ;;  %s4103_s1 = sld [smem:[#allocation14_spill]]  ;;  %s397_s12 = int_to_ptr.vmem [resolvable:$true] %s396_s12 }
  0x2b   : > { %p3736_p8 = pnand %p3365_p11, %p64_p12  ;;  %s387_s30 = scalar_lea.sflag [#allocation6], %s386_s28 }
  0x2d   : > { %p3491_p0 = pneg %p3736_p8 }
  0x30   : > { %s3734_s9 = scalar_lea.hbm %s4103_s1, %s3036_s16  ;;  %s3494_s11 = scalar_lea.hbm %s4103_s1, 32 }
  0x31   : > { %s3489_s14 = scalar_lea.hbm %s3734_s9, 16  ;;  %p3495_p7 = scmp.lt.s32.totalorder %s3734_s9, %s4103_s1 }
  0x32   : > { %p3490_p13 = scmp.ne.s32.totalorder %s3734_s9, %s3489_s14  ;;  %p3496_p9 = scmp.lt.s32.totalorder %s3494_s11, %s3489_s14 }
  0x34   : > { %p3492_p2 = pnand %p3491_p0, %p3490_p13  ;;  %p3497_p10 = por %p3496_p9, %p3495_p7 }
  0x36   : > { %p3493_p3 = pneg %p3492_p2 }
  0x38   : > { %p3498_p11 = pnand %p3497_p10, %p3493_p3 }
  0x3a   : > { %3501 = shalt.err (!%p3498_p11)
}
  0x3b   : > { %s3502_s17 = scalar_lea.vmem %s397_s12, 16  ;;  %s3588_s18 = smov [#allocation5]  }
  0x3c   : > { %p3503_p12 = scmp.ne.s32.totalorder %s397_s12, %s3502_s17  ;;  %s3507_s19 = sshll.u32 %s3588_s18, 4  ;;  %s3508_s19 = int_to_ptr.vmem [resolvable:$false] %s3507_s19 }
  0x3d   : > { %s3509_s20 = scalar_lea.vmem %s3508_s19, 32  ;;  %p3510_p13 = scmp.lt.s32.totalorder %s397_s12, %s3508_s19 }
  0x3e   : > { %p3505_p4 = pnand %p3503_p12, %p3491_p0  ;;  %p3511_p2 = scmp.lt.s32.totalorder %s3509_s20, %s3502_s17 }
  0x40   : > { %p3506_p1 = pneg %p3505_p4  ;;  %p3512_p5 = por %p3511_p2, %p3510_p13 }
  0x42   : > { %p3513_p6 = pnand %p3512_p5, %p3506_p1 }
  0x44   : > { %3516 = shalt.err (!%p3513_p6)
}
  0x45   : > { %3363 = dma.hbm_to_vmem [thread:$0]  (!%p3736_p8), %s3734_s9, 16, %s397_s12, %s387_s30  }
  0x46   : > { %p4105_p3 = scmp.ne.s32.totalorder %s4098_s27, 0 }
  0x47   : > { %p4106_p7 = scmp.eq.s32.totalorder (!%p4105_p3), %s3684_s25, 0 }
  0x48   : > { %473 = sbr.rel (%p4105_p3) target bundleno = 2419 (0x973), region = 68 }
  0x4d   : > { %3558 = dma.done.wait (%p4106_p7), [#allocation3], 256   ;;  %p4107_p4 = pmov %p4106_p7 }
  0x4e   : > { %s479_s28 = sand.u32 1, %s3575_s22   ;;  %p4108_p1 = scmp.ne.s32.totalorder %s4097_s26, 0 }
  0x4f   : > { %3560 = vsyncadd (%p4107_p4), [#allocation3], 4294967040  ;;  %s480_s16 = scalar_lea.sflag [#allocation6], %s479_s28  ;;  %s3761_s14 = scalar_lea.vmem [#allocation5], %s479_s28 }
  0x50   : > { %3562 = dma.done.wait (%p4108_p1), %s480_s16, 16  }
  0x51   : > { %3564 = vsyncadd (%p4108_p1), %s480_s16, 4294967280  ;;  %p555_p5 = scmp.lt.s32.totalorder %s3684_s25, 1  ;;  %s4109_s3 = sld [smem:[#allocation15_spill]] }
  0x52   : > { %s4110_s4 = sld [smem:[#allocation16_spill]]  ;;  %p4114_p6 = scmp.ne.s32.totalorder %s3684_s25, 0 }
  0x53   : > { %s3769_s9 = scalar_select %p555_p5, %s3684_s25, 1 }
  0x54   : > { %s4111_s1 = sld [smem:[#allocation17_spill]] }
  0x55   : > { %s3101_s30 = sshll.u32 %s3769_s9, 5  ;;  %s576_s29 = scalar_lea.vmem %s4078_s7, %s3769_s9 }
  0x56   : > { %s3801_s0 = scalar_lea.vmem %s4079_s8, %s3101_s30  ;;  %s4112_s19 = sld [smem:[#allocation18_spill]] }
  0x57   : > { %s3779_s10 = scalar_lea.vmem %s4109_s3, %s3101_s30  ;;  %s4113_s16 = sld [smem:[#allocation19_spill]] }
  0x58   : > { %s3784_s15 = scalar_lea.vmem %s4110_s4, %s3101_s30  ;;  %s3104_s4 = sshll.u32 %s3769_s9, 6 }
  0x59   : > { %596 = sbr.rel (%p4114_p6) target bundleno = 96 (0x60), region = 80 }
  0x5a   : > { %s584_s3 = scalar_lea.vmem %s4111_s1, %s3769_s9 }
  0x5c   : > { %s3811_s21 = scalar_lea.vmem %s4112_s19, %s3104_s4 }
  0x5d   : > { %s592_s12 = scalar_lea.vmem %s4113_s16, %s3769_s9 }
  0x5e   : > { %v597_v0 = vld [vmem:[#allocation2] sm:$0xff]  ;;  %vm599_vm0 = vcmask 261120   ;;  %v598_v1 = vld [vmem:[#allocation2 + $0x8] sm:$0xff] }
  0x5f   : > { %600 = vst.msk [vmem:[#allocation7] sm:$0xff] %vm599_vm0, %v597_v0  ;;  %601 = vst.msk [vmem:[#allocation7 + $0x8] sm:$0xff] %vm599_vm0, %v598_v1 }
  0x60 PF: > { %vm606_vm1 = vcmask 261120   ;;  %v653_v4 = vld [vmem:[%s3779_s10 + $0x18] sm:$0xff]  ;;  %v652_v6 = vld [vmem:[%s3779_s10 + $0x10] sm:$0xff]  ;;  %s3589_s1 = smov 96   ;;  %v651_v8 = vld [vmem:[%s3779_s10 + $0x8] sm:$0xff]  ;;  %s3590_s4 = smov 64  }
  0x61   : > { %3183 = vmatprep.subr.mxu0 %v653_v4  ;;  %745 = vrot.lane.b32.xlu1 %v652_v6, %s3589_s1  ;;  %v650_v9 = vld [vmem:[%s3779_s10] sm:$0xff]  ;;  %s4115_s19 = scalar_lea.vmem %s4073_s2, %s3769_s9  ;;  %v3591_v44 = vmov 0.0   ;;  %vm3592_vm2 = vmmov 0   ;;  %vm963_vm3 = vcmask 64512   ;;  %s3594_s16 = smov 112   ;;  %vm2776_vm6 = vcmask 523264  }
  0x62   : > { %3184 = vmatpush3.msra.mxu0 %v653_v4  ;;  %v3048_v32 = vld [vmem:[%s3761_s14] ss:$0 sm:$0xff]  ;;  %s3593_s14 = smov 120   ;;  %s3595_s27 = smov 104  }
  0x63   : > { %3185 = vmatprep.subr.mxu0 %v652_v6  ;;  %v3049_v34 = vld [vmem:[%s4115_s19] ss:$0 sm:$0xff]  ;;  %s4116_s24 = scalar_lea.vmem %s4076_s5, %s3769_s9  ;;  %s4117_s17 = scalar_lea.vmem %s4077_s6, %s3769_s9 }
  0x64   : > { %3186 = vmatpush3.msra.mxu0 %v652_v6  ;;  %p3367_p8 = scmp.eq.s32.totalorder %s3684_s25, 1 }
  0x65   : > { %743 = vrot.lane.b32.xlu1 %v651_v8, %s3589_s1  ;;  %3187 = vmatprep.subr.mxu0 %v651_v8 }
  0x66   : > { %v3819_v2 = vld [vmem:[#allocation7] sm:$0xff]  ;;  %v3821_v3 = vld [vmem:[#allocation7 + $0x8] sm:$0xff]  ;;  %3188 = vmatpush3.msra.mxu0 %v651_v8 }
  0x67   : > { %v607_v5 = vsel %vm606_vm1, %v3819_v2, 0.0  ;;  %v610_v7 = vsel %vm606_vm1, %v3821_v3, 0.0  ;;  %3189 = vmatprep.subr.mxu0 %v650_v9 }
  0x68   : > { %608 = vadd.xlane.f32.xlu0 %v607_v5  ;;  %3190 = vmatpush3.msra.mxu0 %v650_v9 }
  0x6c   : > { %611 = vadd.xlane.f32.xlu0 %v610_v7 }
  0x82   : > { %747 = vrot.lane.b32.xlu0 %v653_v4, %s3589_s1 }
  0x86   : > { %834 = vrot.lane.b32.xlu0 %v653_v4, %s3590_s4 }
  0x8a   : > { %830 = vrot.lane.b32.xlu0 %v651_v8, %s3590_s4 }
  0xd3   : > { %v746_v14 = vpop.permute.xlu1 %745 }
  0xd7   : > { %v744_v21 = vpop.permute.xlu1 %743 }
  0xf1   : > { %v609_v10 = vpop.xlane.xlu0 %608 }
  0xf2   : > { %v614_v11 = vmul.f32 0.03125, %v609_v10 }
  0xf4   : > { %v616_v12 = vsub.f32 %v3819_v2, %v614_v11 }
  0xf5   : > { %v612_v13 = vpop.xlane.xlu0 %611 }
  0xf6   : > { %v615_v15 = vmul.f32 0.03125, %v612_v13  ;;  %v618_v16 = vmul.f32 %v616_v12, %v616_v12 }
  0xf8   : > { %v617_v17 = vsub.f32 %v3821_v3, %v615_v15  ;;  %v620_v18 = vsel %vm606_vm1, %v618_v16, 0.0 }
  0xf9   : > { %621 = vadd.xlane.f32.xlu1 %v620_v18  ;;  %v748_v19 = vpop.permute.xlu0 %747 }
  0xfa   : > { %v619_v20 = vmul.f32 %v617_v17, %v617_v17  ;;  %3194 = vmatprep.subr.mxu1 %v748_v19 }
  0xfb   : > { %3195 = vmatpush3.msra.mxu1 %v748_v19 }
  0xfc   : > { %v623_v22 = vsel %vm606_vm1, %v619_v20, 0.0  ;;  %3196 = vmatprep.subr.mxu1 %v746_v14 }
  0xfd   : > { %624 = vadd.xlane.f32.xlu1 %v623_v22  ;;  %3197 = vmatpush3.msra.mxu1 %v746_v14  ;;  %v835_v23 = vpop.permute.xlu0 %834 }
  0xfe   : > { %3198 = vmatprep.subr.mxu1 %v744_v21  ;;  %3205 = vmatprep.subr.mxu0 %v835_v23 }
  0xff   : > { %3199 = vmatpush3.msra.mxu1 %v744_v21 }
 0x101   : > { %v831_v42 = vpop.permute.xlu0 %830 }
 0x10e   : > { %741 = vrot.lane.b32.xlu1 %v650_v9, %s3589_s1 }
 0x112   : > { %832 = vrot.lane.b32.xlu1 %v652_v6, %s3590_s4 }
 0x116   : > { %828 = vrot.lane.b32.xlu1 %v650_v9, %s3590_s4  ;;  %s3597_s4 = smov [#allocation7]  }
 0x117   : > { %s2868_s30 = sshll.u32 %s3597_s4, 4  ;;  %s2869_s30 = int_to_ptr.vmem [resolvable:$true] %s2868_s30 }
 0x118   : > { %s3517_s10 = scalar_lea.vmem %s2869_s30, 256  ;;  %p3524_p11 = scmp.lt.s32.totalorder %s2869_s30, %s2869_s30 }
 0x119   : > { %p3518_p0 = scmp.ne.s32.totalorder %s2869_s30, %s3517_s10  ;;  %p3525_p12 = scmp.lt.s32.totalorder %s3517_s10, %s3517_s10 }
 0x11b   : > { %p3519_p9 = pnand %p3518_p0, %p3367_p8  ;;  %p3526_p13 = por %p3525_p12, %p3524_p11 }
 0x11d   : > { %p3520_p10 = pneg %p3519_p9 }
 0x11f   : > { %p3527_p2 = pnand %p3526_p13, %p3520_p10 }
 0x182   : > { %v622_v24 = vpop.xlane.xlu1 %621 }
 0x183   : > { %v626_v25 = vmul.f32 0.03125, %v622_v24 }
 0x185   : > { %v628_v26 = vadd.f32 1e-05, %v626_v25 }
 0x186   : > { %v625_v27 = vpop.xlane.xlu1 %624 }
 0x187   : > { %3415 = vrsqrt.f32 %v628_v26  ;;  %v627_v28 = vmul.f32 0.03125, %v625_v27 }
 0x189   : > { %v629_v29 = vadd.f32 1e-05, %v627_v28 }
 0x18a   : > { %v742_v30 = vpop.permute.xlu1 %741 }
 0x18b   : > { %3417 = vrsqrt.f32 %v629_v29  ;;  %3200 = vmatprep.subr.mxu1 %v742_v30 }
 0x18c   : > { %3201 = vmatpush3.msra.mxu1 %v742_v30 }
 0x18d   : > { %3221 = vmatprep.subr.mxu1 %v3591_v44 }
 0x18e   : > { %v833_v40 = vpop.permute.xlu1 %832 }
 0x192   : > { %v829_v43 = vpop.permute.xlu1 %828 }
 0x194   : > { %v3416_v31 = vpop.eup %3415 }
 0x195   : > { %v632_v33 = vmul.f32 %v3416_v31, %v616_v12 }
 0x197   : > { %v640_v35 = vmul.f32 %v3048_v32, %v632_v33 }
 0x198   : > { %v3418_v36 = vpop.eup %3417 }
 0x199   : > { %v633_v37 = vmul.f32 %v3418_v36, %v617_v17  ;;  %v648_v38 = vadd.f32 %v3049_v34, %v640_v35 }
 0x19b   : > { %v641_v39 = vmul.f32 %v3048_v32, %v633_v37  ;;  %3191 = vmatprep.mubr.msk.f32.mxu0 %vm606_vm1, %v648_v38  ;;  %3202 = vmatprep.mubr.msk.f32.mxu1 %vm606_vm1, %v648_v38 }
 0x19d   : > { %v649_v41 = vadd.f32 %v3049_v34, %v641_v39 }
 0x19f   : > { %3192 = vmatmul.mubr.msk.f32.vlgmr.msra.gmra.mxu0 %vm606_vm1, %v649_v41  ;;  %3203 = vmatmul.mubr.msk.f32.vlgmr.msra.gmra.mxu1 %vm606_vm1, %v649_v41 }
 0x1a0   : > { %3206 = vmatpush3.msra.mxu0 %v835_v23  ;;  %3213 = vmatprep.mubr.msk.f32.mxu0 %vm606_vm1, %v648_v38 }
 0x1a1   : > { %3207 = vmatprep.subr.mxu0 %v833_v40  ;;  %3223 = vmatprep.mubr.msk.f32.mxu1 %vm3592_vm2, %v3591_v44 }
 0x1a2   : > { %3208 = vmatpush3.msra.mxu0 %v833_v40 }
 0x1a3   : > { %3209 = vmatprep.subr.mxu0 %v831_v42 }
 0x1a4   : > { %3210 = vmatpush3.msra.mxu0 %v831_v42 }
 0x1a5   : > { %3211 = vmatprep.subr.mxu0 %v829_v43 }
 0x1a6   : > { %3212 = vmatpush3.msra.mxu0 %v829_v43 }
 0x1a7   : > { %3214 = vmatmul.mubr.msk.f32.vlgmr.msra.gmra.mxu0 %vm606_vm1, %v649_v41  ;;  %3216 = vmatprep.subr.mxu0 %v3591_v44 }
 0x1a8   : > { %3218 = vmatprep.mubr.msk.f32.mxu0 %vm3592_vm2, %v3591_v44 }
 0x25f   : > { %v3193_v45 = vpop.f32.mrf.mxu0  ;;  %v3204_v46 = vpop.f32.mrf.mxu1 }
 0x260   : > { %v736_v47 = vmul.f32 0.17677669, %v3193_v45  ;;  %933 = vrot.lane.b32.xlu1 %v3204_v46, %s3593_s14  ;;  %3222 = vmatpush3.xpose.msk.msra.mxu1 %vm963_vm3, %v3204_v46 }
 0x261   : > { %v726_v48 = vpop.f32.mrf.mxu0  ;;  %v819_v49 = vpop.f32.mrf.mxu1  ;;  %3231 = vmatprep.subr.mxu1 %v3591_v44 }
 0x262   : > { %v735_v50 = vmul.f32 0.17677669, %v726_v48  ;;  %931 = vrot.lane.b32.xlu0 %v819_v49, %s3593_s14  ;;  %3217 = vmatpush3.xpose.msk.msra.mxu0 %vm963_vm3, %v819_v49 }
 0x263   : > { %3224 = vmatmul.mubr.msk.f32.vlgmr.msra.gmra.mxu1 %vm963_vm3, %v736_v47  ;;  %3226 = vmatprep.subr.mxu0 %v3591_v44 }
 0x264   : > { %937 = vrot.lane.b32.xlu1 %v3204_v46, %s3594_s16  ;;  %3233 = vmatprep.mubr.msk.f32.mxu1 %vm3592_vm2, %v3591_v44 }
 0x265   : > { %3219 = vmatmul.mubr.msk.f32.vlgmr.msra.gmra.mxu0 %vm963_vm3, %v735_v50 }
 0x266   : > { %935 = vrot.lane.b32.xlu0 %v819_v49, %s3594_s16  ;;  %3228 = vmatprep.mubr.msk.f32.mxu0 %vm3592_vm2, %v3591_v44 }
 0x267   : > { %v3897_v61 = vpop.f32.mrf.mxu0 }
 0x268   : > { %941 = vrot.lane.b32.xlu1 %v3204_v46, %s3595_s27 }
 0x269   : > { %v3909_v0 = vpop.f32.mrf.mxu0 }
 0x26a   : > { %939 = vrot.lane.b32.xlu0 %v819_v49, %s3595_s27 }
 0x26c   : > { %919 = vrot.lane.b32.xlu1 %v736_v47, %s3593_s14 }
 0x26e   : > { %917 = vrot.lane.b32.xlu0 %v735_v50, %s3593_s14 }
 0x270   : > { %923 = vrot.lane.b32.xlu1 %v736_v47, %s3594_s16 }
 0x272   : > { %921 = vrot.lane.b32.xlu0 %v735_v50, %s3594_s16 }
 0x274   : > { %927 = vrot.lane.b32.xlu1 %v736_v47, %s3595_s27 }
 0x276   : > { %925 = vrot.lane.b32.xlu0 %v735_v50, %s3595_s27 }
 0x2d2   : > { %v934_v51 = vpop.permute.xlu1 %933 }
 0x2d3   : > { %3232 = vmatpush3.xpose.msk.msra.mxu1 %vm963_vm3, %v934_v51 }
 0x2d4   : > { %v932_v52 = vpop.permute.xlu0 %931  ;;  %3241 = vmatprep.subr.mxu1 %v3591_v44 }
 0x2d5   : > { %3227 = vmatpush3.xpose.msk.msra.mxu0 %vm963_vm3, %v932_v52 }
 0x2d6   : > { %v938_v53 = vpop.permute.xlu1 %937  ;;  %3236 = vmatprep.subr.mxu0 %v3591_v44 }
 0x2d8   : > { %v936_v54 = vpop.permute.xlu0 %935 }
 0x2da   : > { %v942_v55 = vpop.permute.xlu1 %941 }
 0x2dc   : > { %v940_v56 = vpop.permute.xlu0 %939 }
 0x2de   : > { %v920_v57 = vpop.permute.xlu1 %919 }
 0x2df   : > { %3234 = vmatmul.mubr.msk.f32.vlgmr.msra.gmra.mxu1 %vm963_vm3, %v920_v57 }
 0x2e0   : > { %3242 = vmatpush3.xpose.msk.msra.mxu1 %vm963_vm3, %v938_v53  ;;  %v918_v58 = vpop.permute.xlu0 %917  ;;  %3243 = vmatprep.mubr.msk.f32.mxu1 %vm3592_vm2, %v3591_v44 }
 0x2e1   : > { %3229 = vmatmul.mubr.msk.f32.vlgmr.msra.gmra.mxu0 %vm963_vm3, %v918_v58  ;;  %3251 = vmatprep.subr.mxu1 %v3591_v44 }
 0x2e2   : > { %3237 = vmatpush3.xpose.msk.msra.mxu0 %vm963_vm3, %v936_v54  ;;  %v924_v59 = vpop.permute.xlu1 %923  ;;  %3238 = vmatprep.mubr.msk.f32.mxu0 %vm3592_vm2, %v3591_v44 }
 0x2e3   : > { %3244 = vmatmul.mubr.msk.f32.vlgmr.msra.gmra.mxu1 %vm963_vm3, %v924_v59  ;;  %3246 = vmatprep.subr.mxu0 %v3591_v44 }
 0x2e4   : > { %3252 = vmatpush3.xpose.msk.msra.mxu1 %vm963_vm3, %v942_v55  ;;  %v922_v60 = vpop.permute.xlu0 %921  ;;  %3253 = vmatprep.mubr.msk.f32.mxu1 %vm3592_vm2, %v3591_v44 }
 0x2e5   : > { %3239 = vmatmul.mubr.msk.f32.vlgmr.msra.gmra.mxu0 %vm963_vm3, %v922_v60  ;;  %3261 = vmatprep.subr.mxu1 %v3591_v44 }
 0x2e6   : > { %3247 = vmatpush3.xpose.msk.msra.mxu0 %vm963_vm3, %v940_v56  ;;  %v928_v62 = vpop.permute.xlu1 %927  ;;  %3248 = vmatprep.mubr.msk.f32.mxu0 %vm3592_vm2, %v3591_v44 }
 0x2e7   : > { %3254 = vmatmul.mubr.msk.f32.vlgmr.msra.gmra.mxu1 %vm963_vm3, %v928_v62  ;;  %3256 = vmatprep.subr.mxu0 %v3591_v44 }
 0x2e8   : > { %3262 = vmatpush3.msra.mxu1 %v3897_v61  ;;  %v926_v63 = vpop.permute.xlu0 %925  ;;  %3263 = vmatprep.mubr.msk.f32.mxu1 %vm3592_vm2, %v3591_v44 }
 0x2e9   : > { %3249 = vmatmul.mubr.msk.f32.vlgmr.msra.gmra.mxu0 %vm963_vm3, %v926_v63  ;;  %3271 = vmatprep.subr.mxu1 %v3591_v44 }
 0x2ea   : > { %3257 = vmatpush3.msra.mxu0 %v3909_v0  ;;  %3258 = vmatprep.mubr.msk.f32.mxu0 %vm3592_vm2, %v3591_v44 }
 0x2eb   : > { %3266 = vmatprep.subr.mxu0 %v3591_v44 }
 0x323   : > { %v1108_v1 = vpop.f32.mrf.mxu1 }
 0x324   : > { %v1559_v4 = vsel %vm963_vm3, %v1108_v1, -inf }
 0x325   : > { %1560 = vmax.xlane.f32.xlu1 %v1559_v4  ;;  %v1034_v5 = vpop.f32.mrf.mxu0  ;;  %v3225_v6 = vpop.f32.mrf.mxu1 }
 0x326   : > { %v1556_v7 = vsel %vm963_vm3, %v1034_v5, -inf }
 0x327   : > { %1557 = vmax.xlane.f32.xlu0 %v1556_v7  ;;  %v3220_v8 = vpop.f32.mrf.mxu0 }
 0x39f   : > { %v1256_v9 = vpop.f32.mrf.mxu1 }
 0x3a0   : > { %v1565_v10 = vsel %vm963_vm3, %v1256_v9, -inf }
 0x3a1   : > { %v3235_v11 = vpop.f32.mrf.mxu1  ;;  %1566 = vmax.xlane.f32.xlu0 %v1565_v10  ;;  %v1182_v12 = vpop.f32.mrf.mxu0 }
 0x3a2   : > { %v1562_v16 = vsel %vm963_vm3, %v1182_v12, -inf }
 0x3a3   : > { %v3230_v13 = vpop.f32.mrf.mxu0  ;;  %v1404_v14 = vpop.f32.mrf.mxu1 }
 0x3a4   : > { %v1571_v15 = vsel %vm963_vm3, %v1404_v14, -inf }
 0x3a5   : > { %1572 = vmax.xlane.f32.xlu1 %v1571_v15  ;;  %v3245_v17 = vpop.f32.mrf.mxu1  ;;  %1563 = vmax.xlane.f32.xlu0 %v1562_v16  ;;  %v1330_v18 = vpop.f32.mrf.mxu0 }
 0x3a6   : > { %v1568_v22 = vsel %vm963_vm3, %v1330_v18, -inf }
 0x3a7   : > { %v3240_v19 = vpop.f32.mrf.mxu0  ;;  %v1552_v20 = vpop.f32.mrf.mxu1 }
 0x3a8   : > { %v1577_v21 = vsel %vm963_vm3, %v1552_v20, -inf }
 0x3a9   : > { %1578 = vmax.xlane.f32.xlu1 %v1577_v21  ;;  %v3255_v23 = vpop.f32.mrf.mxu1  ;;  %1569 = vmax.xlane.f32.xlu0 %v1568_v22  ;;  %v1478_v24 = vpop.f32.mrf.mxu0 }
 0x3aa   : > { %v1574_v26 = vsel %vm963_vm3, %v1478_v24, -inf }
 0x3ab   : > { %v3250_v25 = vpop.f32.mrf.mxu0 }
 0x3ad   : > { %1575 = vmax.xlane.f32.xlu0 %v1574_v26 }
 0x3ae   : > { %v1561_v29 = vpop.xlane.xlu1 %1560 }
 0x3af   : > { %v1581_v30 = vsub.f32 %v1108_v1, %v1561_v29 }
 0x3b0   : > { %v1558_v27 = vpop.xlane.xlu0 %1557 }
 0x3b1   : > { %v1580_v28 = vsub.f32 %v1034_v5, %v1558_v27  ;;  %v1590_v32 = vmul.f32 1.442695, %v1581_v30  ;;  %v2228_v30 = vld [vmem:[%s3784_s15] sm:$0xff] }
 0x3b3   : > { %v1588_v31 = vmul.f32 1.442695, %v1580_v28 }
 0x3b5   : > { %3419 = vpow2.f32 %v1588_v31 }
 0x3b6   : > { %3421 = vpow2.f32 %v1590_v32 }
 0x3ba   : > { %947 = vrot.lane.b32.xlu1 %v3897_v61, %s3593_s14 }
 0x3be   : > { %951 = vrot.lane.b32.xlu1 %v3909_v0, %s3594_s16 }
 0x3c2   : > { %953 = vrot.lane.b32.xlu1 %v3897_v61, %s3594_s16  ;;  %v3420_v33 = vpop.eup %3419 }
 0x3c3   : > { %945 = vrot.lane.b32.xlu0 %v3909_v0, %s3593_s14  ;;  %v1604_v34 = vsel %vm963_vm3, %v3420_v33, 0.0  ;;  %v3422_v35 = vpop.eup %3421 }
 0x3c4   : > { %v1607_v36 = vsel %vm963_vm3, %v3422_v35, 0.0 }
 0x3e2   : > { %1605 = vadd.xlane.f32.xlu0 %v1604_v34 }
 0x3e6   : > { %1608 = vadd.xlane.f32.xlu1 %v1607_v36 }
 0x42a   : > { %v1567_v37 = vpop.xlane.xlu0 %1566 }
 0x42b   : > { %v1583_v38 = vsub.f32 %v1256_v9, %v1567_v37  ;;  %v2229_v37 = vld [vmem:[%s3784_s15 + $0x8] sm:$0xff] }
 0x42d   : > { %v1594_v39 = vmul.f32 1.442695, %v1583_v38  ;;  %v2392_v38 = vld [vmem:[%s3784_s15 + $0x10] sm:$0xff] }
 0x42e   : > { %v1573_v40 = vpop.xlane.xlu1 %1572  ;;  %v1564_v41 = vpop.xlane.xlu0 %1563 }
 0x42f   : > { %3423 = vpow2.f32 %v1594_v39  ;;  %v1585_v42 = vsub.f32 %v1404_v14, %v1573_v40  ;;  %v1582_v43 = vsub.f32 %v1182_v12, %v1564_v41  ;;  %v2476_v39 = vld [vmem:[%s3784_s15 + $0x18] sm:$0xff] }
 0x431   : > { %v1598_v45 = vmul.f32 1.442695, %v1585_v42  ;;  %v1592_v46 = vmul.f32 1.442695, %v1582_v43 }
 0x432   : > { %v1579_v47 = vpop.xlane.xlu1 %1578  ;;  %v1570_v48 = vpop.xlane.xlu0 %1569 }
 0x433   : > { %3425 = vpow2.f32 %v1598_v45  ;;  %v1587_v49 = vsub.f32 %v1552_v20, %v1579_v47  ;;  %v1584_v50 = vsub.f32 %v1330_v18, %v1570_v48 }
 0x434   : > { %3427 = vpow2.f32 %v1592_v46 }
 0x435   : > { %v1602_v51 = vmul.f32 1.442695, %v1587_v49  ;;  %v1596_v52 = vmul.f32 1.442695, %v1584_v50 }
 0x436   : > { %v1576_v53 = vpop.xlane.xlu0 %1575  ;;  %v948_v8 = vpop.permute.xlu1 %947 }
 0x437   : > { %3429 = vpow2.f32 %v1602_v51  ;;  %v1586_v54 = vsub.f32 %v1478_v24, %v1576_v53 }
 0x438   : > { %3431 = vpow2.f32 %v1596_v52 }
 0x439   : > { %v1600_v55 = vmul.f32 1.442695, %v1586_v54 }
 0x43a   : > { %v952_v9 = vpop.permute.xlu1 %951  ;;  %v946_v10 = vpop.permute.xlu0 %945 }
 0x43b   : > { %3433 = vpow2.f32 %v1600_v55 }
 0x43c   : > { %v3424_v56 = vpop.eup %3423 }
 0x43d   : > { %v1613_v57 = vsel %vm963_vm3, %v3424_v56, 0.0 }
 0x43e   : > { %1614 = vadd.xlane.f32.xlu1 %v1613_v57  ;;  %v954_v11 = vpop.permute.xlu1 %953 }
 0x440   : > { %v3426_v58 = vpop.eup %3425 }
 0x441   : > { %v3428_v59 = vpop.eup %3427  ;;  %v1619_v60 = vsel %vm963_vm3, %v3426_v58, 0.0 }
 0x442   : > { %1620 = vadd.xlane.f32.xlu1 %v1619_v60  ;;  %v1610_v62 = vsel %vm963_vm3, %v3428_v59, 0.0 }
 0x443   : > { %1611 = vadd.xlane.f32.xlu0 %v1610_v62 }
 0x444   : > { %v3430_v63 = vpop.eup %3429 }
 0x445   : > { %v3938_v1 = vpop.eup %3431  ;;  %v1625_v4 = vsel %vm963_vm3, %v3430_v63, 0.0 }
 0x446   : > { %1626 = vadd.xlane.f32.xlu1 %v1625_v4  ;;  %v1616_v5 = vsel %vm963_vm3, %v3938_v1, 0.0 }
 0x447   : > { %1617 = vadd.xlane.f32.xlu0 %v1616_v5 }
 0x448   : > { %v3943_v6 = vpop.eup %3433 }
 0x449   : > { %v1622_v7 = vsel %vm963_vm3, %v3943_v6, 0.0 }
 0x44b   : > { %1623 = vadd.xlane.f32.xlu0 %v1622_v7 }
 0x457   : > { %959 = vrot.lane.b32.xlu1 %v3897_v61, %s3595_s27 }
 0x461   : > { %957 = vrot.lane.b32.xlu0 %v3909_v0, %s3595_s27 }
 0x46b   : > { %v1606_v12 = vpop.xlane.xlu0 %1605 }
 0x46c   : > { %3435 = vrcp.f32 %v1606_v12 }
 0x46f   : > { %v1609_v13 = vpop.xlane.xlu1 %1608 }
 0x470   : > { %3437 = vrcp.f32 %v1609_v13 }
 0x479   : > { %v3436_v14 = vpop.eup %3435 }
 0x47a   : > { %v1629_v15 = vmul.f32 %v3436_v14, %v3420_v33 }
 0x47c   : > { %3259 = vmatmul.mubr.msk.f32.vlgmr.msra.gmra.mxu0 %vm963_vm3, %v1629_v15 }
 0x47d   : > { %v3438_v16 = vpop.eup %3437  ;;  %3267 = vmatpush3.msra.mxu0 %v946_v10  ;;  %3268 = vmatprep.mubr.msk.f32.mxu0 %vm3592_vm2, %v3591_v44 }
 0x47e   : > { %v1631_v61 = vmul.f32 %v3438_v16, %v3422_v35  ;;  %3276 = vmatprep.subr.mxu0 %v3591_v44 }
 0x480   : > { %3264 = vmatmul.mubr.msk.f32.vlgmr.msra.gmra.mxu1 %vm963_vm3, %v1631_v61 }
 0x481   : > { %3272 = vmatpush3.msra.mxu1 %v948_v8  ;;  %3273 = vmatprep.mubr.msk.f32.mxu1 %vm3592_vm2, %v3591_v44  ;;  %v3088_v8 = vld [vmem:[%s4116_s24] ss:$0 sm:$0xff] }
 0x482   : > { %3281 = vmatprep.subr.mxu1 %v3591_v44 }
 0x4c7   : > { %v1615_v0 = vpop.xlane.xlu1 %1614 }
 0x4c8   : > { %3439 = vrcp.f32 %v1615_v0 }
 0x4cb   : > { %v1621_v17 = vpop.xlane.xlu1 %1620 }
 0x4cc   : > { %3441 = vrcp.f32 %v1621_v17  ;;  %v1612_v18 = vpop.xlane.xlu0 %1611 }
 0x4cd   : > { %3443 = vrcp.f32 %v1612_v18 }
 0x4cf   : > { %v1627_v19 = vpop.xlane.xlu1 %1626 }
 0x4d0   : > { %3445 = vrcp.f32 %v1627_v19  ;;  %v1618_v20 = vpop.xlane.xlu0 %1617 }
 0x4d1   : > { %3447 = vrcp.f32 %v1618_v20 }
 0x4d3   : > { %v960_v28 = vpop.permute.xlu1 %959 }
 0x4d4   : > { %v1624_v21 = vpop.xlane.xlu0 %1623 }
 0x4d5   : > { %v3440_v22 = vpop.eup %3439  ;;  %3449 = vrcp.f32 %v1624_v21 }
 0x4d6   : > { %v1635_v23 = vmul.f32 %v3440_v22, %v3424_v56 }
 0x4d8   : > { %3274 = vmatmul.mubr.msk.f32.vlgmr.msra.gmra.mxu1 %vm963_vm3, %v1635_v23  ;;  %v958_v34 = vpop.permute.xlu0 %957  ;;  %v2618_v23 = vld [vmem:[%s3801_s0 + $0x18] sm:$0xff] }
 0x4d9   : > { %v3442_v24 = vpop.eup %3441  ;;  %3282 = vmatpush3.msra.mxu1 %v954_v11  ;;  %3283 = vmatprep.mubr.msk.f32.mxu1 %vm3592_vm2, %v3591_v44 }
 0x4da   : > { %v3444_v25 = vpop.eup %3443  ;;  %3291 = vmatprep.subr.mxu1 %v3591_v44  ;;  %v1639_v26 = vmul.f32 %v3442_v24, %v3426_v58  ;;  %v2617_v24 = vld [vmem:[%s3801_s0 + $0x10] sm:$0xff] }
 0x4db   : > { %v1633_v27 = vmul.f32 %v3444_v25, %v3428_v59  ;;  %v2616_v25 = vld [vmem:[%s3801_s0 + $0x8] sm:$0xff] }
 0x4dc   : > { %3284 = vmatmul.mubr.msk.f32.vlgmr.msra.gmra.mxu1 %vm963_vm3, %v1639_v26  ;;  %v2615_v26 = vld [vmem:[%s3801_s0] sm:$0xff] }
 0x4dd   : > { %v3446_v29 = vpop.eup %3445  ;;  %3269 = vmatmul.mubr.msk.f32.vlgmr.msra.gmra.mxu0 %vm963_vm3, %v1633_v27  ;;  %3292 = vmatpush3.msra.mxu1 %v960_v28 }
 0x4de   : > { %v3448_v31 = vpop.eup %3447  ;;  %3277 = vmatpush3.msra.mxu0 %v952_v9  ;;  %3278 = vmatprep.mubr.msk.f32.mxu0 %vm3592_vm2, %v3591_v44  ;;  %v1643_v32 = vmul.f32 %v3446_v29, %v3430_v63 }
 0x4df   : > { %3286 = vmatprep.subr.mxu0 %v3591_v44  ;;  %3293 = vmatprep.mubr.msk.f32.mxu1 %vm3592_vm2, %v3591_v44  ;;  %v1637_v33 = vmul.f32 %v3448_v31, %v3938_v1 }
 0x4e0   : > { %3294 = vmatmul.mubr.msk.f32.vlgmr.msra.gmra.mxu1 %vm963_vm3, %v1643_v32  ;;  %3301 = vmatprep.subr.mxu1 %v2228_v30 }
 0x4e1   : > { %3279 = vmatmul.mubr.msk.f32.vlgmr.msra.gmra.mxu0 %vm963_vm3, %v1637_v33  ;;  %3302 = vmatpush3.msra.mxu1 %v2228_v30 }
 0x4e2   : > { %v3450_v35 = vpop.eup %3449  ;;  %3287 = vmatpush3.msra.mxu0 %v958_v34  ;;  %3288 = vmatprep.mubr.msk.f32.mxu0 %vm3592_vm2, %v3591_v44  ;;  %v3089_v34 = vld [vmem:[%s4117_s17] ss:$0 sm:$0xff] }
 0x4e3   : > { %v1641_v36 = vmul.f32 %v3450_v35, %v3943_v6  ;;  %3296 = vmatprep.subr.mxu0 %v2229_v37  ;;  %3311 = vmatprep.subr.mxu1 %v2476_v39 }
 0x4e5   : > { %3289 = vmatmul.mubr.msk.f32.vlgmr.msra.gmra.mxu0 %vm963_vm3, %v1641_v36  ;;  %v3090_v36 = vld [vmem:[%s576_s29] ss:$0 sm:$0xff] }
 0x4e6   : > { %3297 = vmatpush3.msra.mxu0 %v2229_v37 }
 0x4e7   : > { %3306 = vmatprep.subr.mxu0 %v2392_v38 }
 0x53c   : > { %v1713_v40 = vpop.f32.mrf.mxu0 }
 0x53d   : > { %3303 = vmatprep.mubr.msk.f32.mxu1 %vm963_vm3, %v1713_v40 }
 0x53e   : > { %v3260_v41 = vpop.f32.mrf.mxu0 }
 0x540   : > { %v1786_v42 = vpop.f32.mrf.mxu1 }
 0x541   : > { %3304 = vmatmul.mubr.msk.f32.vlgmr.msra.gmra.mxu1 %vm963_vm3, %v1786_v42 }
 0x542   : > { %v3265_v43 = vpop.f32.mrf.mxu1  ;;  %3312 = vmatpush3.msra.mxu1 %v2476_v39 }
 0x543   : > { %v2768_v43 = vld [vmem:[%s3811_s21 + $0x38] sm:$0xff] }
 0x544   : > { %3327 = vmatprep.subr.mxu1 %v2768_v43 }
 0x598   : > { %v1932_v44 = vpop.f32.mrf.mxu1 }
 0x59a   : > { %v3275_v45 = vpop.f32.mrf.mxu1 }
 0x59b   : > { %v2766_v45 = vld [vmem:[%s3811_s21 + $0x28] sm:$0xff] }
 0x59c   : > { %v2078_v46 = vpop.f32.mrf.mxu1 }
 0x59d   : > { %v1859_v47 = vpop.f32.mrf.mxu0 }
 0x59e   : > { %3298 = vmatprep.mubr.msk.f32.mxu0 %vm963_vm3, %v1859_v47  ;;  %v3285_v48 = vpop.f32.mrf.mxu1  ;;  %v2764_v47 = vld [vmem:[%s3811_s21 + $0x18] sm:$0xff] }
 0x59f   : > { %v3270_v49 = vpop.f32.mrf.mxu0  ;;  %3299 = vmatmul.mubr.msk.f32.vlgmr.msra.gmra.mxu0 %vm963_vm3, %v1932_v44  ;;  %v2767_v44 = vld [vmem:[%s3811_s21 + $0x30] sm:$0xff] }
 0x5a0   : > { %v2224_v50 = vpop.f32.mrf.mxu1  ;;  %3307 = vmatpush3.msra.mxu0 %v2392_v38  ;;  %v2763_v48 = vld [vmem:[%s3811_s21 + $0x10] sm:$0xff]  ;;  %v2762_v49 = vld [vmem:[%s3811_s21 + $0x8] sm:$0xff] }
 0x5a1   : > { %v2005_v51 = vpop.f32.mrf.mxu0  ;;  %3316 = vmatprep.subr.mxu0 %v2618_v23 }
 0x5a2   : > { %3308 = vmatprep.mubr.msk.f32.mxu0 %vm963_vm3, %v2005_v51  ;;  %v3295_v52 = vpop.f32.mrf.mxu1  ;;  %v3091_v51 = vld [vmem:[%s584_s3] ss:$0 sm:$0xff] }
 0x5a3   : > { %v3280_v53 = vpop.f32.mrf.mxu0  ;;  %3309 = vmatmul.mubr.msk.f32.vlgmr.msra.gmra.mxu0 %vm963_vm3, %v2078_v46  ;;  %v2765_v46 = vld [vmem:[%s3811_s21 + $0x20] sm:$0xff] }
 0x5a4   : > { %3317 = vmatpush3.msra.mxu0 %v2618_v23 }
 0x5a5   : > { %v2151_v54 = vpop.f32.mrf.mxu0  ;;  %3318 = vmatprep.subr.mxu0 %v2617_v24 }
 0x5a6   : > { %3313 = vmatprep.mubr.msk.f32.mxu1 %vm963_vm3, %v2151_v54  ;;  %3319 = vmatpush3.msra.mxu0 %v2617_v24 }
 0x5a7   : > { %v3290_v55 = vpop.f32.mrf.mxu0  ;;  %3314 = vmatmul.mubr.msk.f32.vlgmr.msra.gmra.mxu1 %vm963_vm3, %v2224_v50  ;;  %3320 = vmatprep.subr.mxu0 %v2616_v25  ;;  %v2761_v50 = vld [vmem:[%s3811_s21] sm:$0xff] }
 0x5a8   : > { %3321 = vmatpush3.msra.mxu0 %v2616_v25  ;;  %3328 = vmatpush3.msra.mxu1 %v2768_v43 }
 0x5a9   : > { %3322 = vmatprep.subr.mxu0 %v2615_v26  ;;  %3329 = vmatprep.subr.mxu1 %v2767_v44 }
 0x5aa   : > { %3323 = vmatpush3.msra.mxu0 %v2615_v26  ;;  %3330 = vmatpush3.msra.mxu1 %v2767_v44 }
 0x5ab   : > { %3331 = vmatprep.subr.mxu1 %v2766_v45 }
 0x5ac   : > { %3332 = vmatpush3.msra.mxu1 %v2766_v45  ;;  %v3094_v45 = vld [vmem:[%s592_s12] ss:$0 sm:$0xff] }
 0x5ad   : > { %3333 = vmatprep.subr.mxu1 %v2765_v46 }
 0x5ae   : > { %3334 = vmatpush3.msra.mxu1 %v2765_v46 }
 0x5af   : > { %3335 = vmatprep.subr.mxu1 %v2764_v47 }
 0x5b0   : > { %3336 = vmatpush3.msra.mxu1 %v2764_v47 }
 0x5b1   : > { %3337 = vmatprep.subr.mxu1 %v2763_v48 }
 0x5b2   : > { %3338 = vmatpush3.msra.mxu1 %v2763_v48 }
 0x5b3   : > { %3339 = vmatprep.subr.mxu1 %v2762_v49 }
 0x5b4   : > { %3340 = vmatpush3.msra.mxu1 %v2762_v49 }
 0x5b5   : > { %3341 = vmatprep.subr.mxu1 %v2761_v50 }
 0x5b6   : > { %3342 = vmatpush3.msra.mxu1 %v2761_v50 }
 0x601   : > { %v3305_v57 = vpop.f32.mrf.mxu1 }
 0x603   : > { %v2383_v62 = vpop.f32.mrf.mxu1 }
 0x65f   : > { %v3300_v56 = vpop.f32.mrf.mxu0 }
 0x660   : > { %v2389_v60 = vadd.f32 %v3305_v57, %v3300_v56 }
 0x661   : > { %v2302_v58 = vpop.f32.mrf.mxu0 }
 0x662   : > { %v2384_v1 = vadd.f32 %v2383_v62, %v2302_v58 }
 0x663   : > { %v3310_v59 = vpop.f32.mrf.mxu0 }
 0x664   : > { %v2475_v4 = vadd.f32 %v3310_v59, %v2389_v60 }
 0x665   : > { %v2465_v63 = vpop.f32.mrf.mxu0 }
 0x666   : > { %v2474_v6 = vadd.f32 %v2465_v63, %v2384_v1 }
 0x667   : > { %v3315_v5 = vpop.f32.mrf.mxu1 }
 0x668   : > { %v2559_v7 = vadd.f32 %v3315_v5, %v2475_v4 }
 0x669   : > { %v2549_v9 = vpop.f32.mrf.mxu1 }
 0x66a   : > { %v2561_v10 = vadd.f32 %v2559_v7, %v3821_v3  ;;  %v2558_v11 = vadd.f32 %v2549_v9, %v2474_v6 }
 0x66c   : > { %v3995_v12 = vadd.f32 %v3088_v8, %v2561_v10  ;;  %v2560_v13 = vadd.f32 %v2558_v11, %v3819_v2 }
 0x66e   : > { %v3998_v14 = vadd.f32 %v3088_v8, %v2560_v13  ;;  %v2576_v15 = vsel %vm606_vm1, %v3995_v12, 0.0 }
 0x66f   : > { %2577 = vadd.xlane.f32.xlu1 %v2576_v15 }
 0x670   : > { %v2573_v16 = vsel %vm606_vm1, %v3998_v14, 0.0 }
 0x671   : > { %2574 = vadd.xlane.f32.xlu0 %v2573_v16 }
 0x6f8   : > { %v2578_v61 = vpop.xlane.xlu1 %2577 }
 0x6f9   : > { %v2580_v3 = vmul.f32 0.03125, %v2578_v61 }
 0x6fa   : > { %v2575_v0 = vpop.xlane.xlu0 %2574 }
 0x6fb   : > { %v2579_v17 = vmul.f32 0.03125, %v2575_v0  ;;  %v2582_v18 = vsub.f32 %v3995_v12, %v2580_v3 }
 0x6fd   : > { %v2581_v2 = vsub.f32 %v3998_v14, %v2579_v17  ;;  %v2584_v21 = vmul.f32 %v2582_v18, %v2582_v18 }
 0x6ff   : > { %v2583_v19 = vmul.f32 %v2581_v2, %v2581_v2  ;;  %v2588_v22 = vsel %vm606_vm1, %v2584_v21, 0.0 }
 0x701   : > { %v2585_v20 = vsel %vm606_vm1, %v2583_v19, 0.0 }
 0x702   : > { %2586 = vadd.xlane.f32.xlu0 %v2585_v20 }
 0x706   : > { %2589 = vadd.xlane.f32.xlu0 %v2588_v22 }
 0x78b   : > { %v2587_v27 = vpop.xlane.xlu0 %2586 }
 0x78c   : > { %v2591_v28 = vmul.f32 0.03125, %v2587_v27 }
 0x78e   : > { %v2593_v29 = vadd.f32 1e-05, %v2591_v28 }
 0x78f   : > { %v2590_v30 = vpop.xlane.xlu0 %2589 }
 0x790   : > { %3451 = vrsqrt.f32 %v2593_v29  ;;  %v2592_v31 = vmul.f32 0.03125, %v2590_v30 }
 0x792   : > { %v2594_v32 = vadd.f32 1e-05, %v2592_v31 }
 0x794   : > { %3453 = vrsqrt.f32 %v2594_v32  ;;  %v3596_v32 = vmov 1.0  }
 0x79d   : > { %v3452_v33 = vpop.eup %3451 }
 0x79e   : > { %v2597_v35 = vmul.f32 %v3452_v33, %v2581_v2 }
 0x7a0   : > { %v2605_v37 = vmul.f32 %v3089_v34, %v2597_v35 }
 0x7a1   : > { %v3454_v38 = vpop.eup %3453 }
 0x7a2   : > { %v2598_v39 = vmul.f32 %v3454_v38, %v2582_v18  ;;  %v2613_v40 = vadd.f32 %v3090_v36, %v2605_v37 }
 0x7a4   : > { %v2606_v41 = vmul.f32 %v3089_v34, %v2598_v39  ;;  %3324 = vmatprep.mubr.msk.f32.mxu0 %vm606_vm1, %v2613_v40 }
 0x7a6   : > { %v2614_v42 = vadd.f32 %v3090_v36, %v2606_v41 }
 0x7a8   : > { %3325 = vmatmul.mubr.msk.f32.vlgmr.msra.gmra.mxu0 %vm606_vm1, %v2614_v42 }
 0x868   : > { %v3326_v52 = vpop.f32.mrf.mxu0 }
 0x869   : > { %v2704_v53 = vadd.f32 %v3326_v52, %v3091_v51 }
 0x86a   : > { %v2698_v54 = vpop.f32.mrf.mxu0 }
 0x86b   : > { %v2710_v55 = vmul.f32 0.70710677, %v2704_v53  ;;  %v2699_v56 = vadd.f32 %v3091_v51, %v2698_v54  ;;  %v2708_v42 = vmul.f32 0.5, %v2704_v53 }
 0x86d   : > { %v2716_v57 = vand.u32 2147483647, %v2710_v55  ;;  %v2709_v58 = vmul.f32 0.70710677, %v2699_v56  ;;  %vm2712_vm4 = vcmp.lt.f32.partialorder %v2710_v55, 0.0  ;;  %v2707_v40 = vmul.f32 0.5, %v2699_v56 }
 0x86e   : > { %v2714_v33 = vsel %vm2712_vm4, -1.0, %v3596_v32 }
 0x86f   : > { %v2718_v59 = vmul.f32 0.3275911, %v2716_v57  ;;  %v2715_v60 = vand.u32 2147483647, %v2709_v58  ;;  %v2744_v4 = vsub.f32 0.0, %v2716_v57  ;;  %vm2711_vm5 = vcmp.lt.f32.partialorder %v2709_v58, 0.0 }
 0x870   : > { %v2713_v37 = vsel %vm2711_vm5, -1.0, %v3596_v32 }
 0x871   : > { %v2720_v62 = vadd.f32 1.0, %v2718_v59  ;;  %v2717_v63 = vmul.f32 0.3275911, %v2715_v60  ;;  %v2743_v5 = vsub.f32 0.0, %v2715_v60  ;;  %v2746_v6 = vmul.f32 %v2744_v4, %v2716_v57 }
 0x873   : > { %3455 = vrcp.f32 %v2720_v62  ;;  %v2719_v1 = vadd.f32 1.0, %v2717_v63  ;;  %v2745_v8 = vmul.f32 %v2743_v5, %v2715_v60  ;;  %v2749_v10 = vmul.f32 1.442695, %v2746_v6 }
 0x875   : > { %3457 = vrcp.f32 %v2719_v1  ;;  %v2747_v16 = vmul.f32 1.442695, %v2745_v8 }
 0x876   : > { %3459 = vpow2.f32 %v2749_v10 }
 0x877   : > { %3461 = vpow2.f32 %v2747_v16 }
 0x880   : > { %v3456_v7 = vpop.eup %3455 }
 0x881   : > { %v2726_v9 = vmul.f32 1.0614054, %v3456_v7 }
 0x882   : > { %v3458_v11 = vpop.eup %3457 }
 0x883   : > { %v2728_v13 = vadd.f32 -1.4531521, %v2726_v9  ;;  %v2725_v15 = vmul.f32 1.0614054, %v3458_v11  ;;  %v3460_v26 = vpop.eup %3459 }
 0x884   : > { %v3462_v30 = vpop.eup %3461 }
 0x885   : > { %v2730_v61 = vmul.f32 %v3456_v7, %v2728_v13  ;;  %v2727_v3 = vadd.f32 -1.4531521, %v2725_v15 }
 0x887   : > { %v2732_v0 = vadd.f32 1.4214138, %v2730_v61  ;;  %v2729_v17 = vmul.f32 %v3458_v11, %v2727_v3 }
 0x889   : > { %v2734_v18 = vmul.f32 %v3456_v7, %v2732_v0  ;;  %v2731_v2 = vadd.f32 1.4214138, %v2729_v17 }
 0x88b   : > { %v2736_v19 = vadd.f32 -0.28449672, %v2734_v18  ;;  %v2733_v20 = vmul.f32 %v3458_v11, %v2731_v2 }
 0x88d   : > { %v2738_v21 = vmul.f32 %v3456_v7, %v2736_v19  ;;  %v2735_v22 = vadd.f32 -0.28449672, %v2733_v20 }
 0x88f   : > { %v2740_v23 = vadd.f32 0.2548296, %v2738_v21  ;;  %v2737_v24 = vmul.f32 %v3458_v11, %v2735_v22 }
 0x891   : > { %v2742_v25 = vmul.f32 %v3456_v7, %v2740_v23  ;;  %v2739_v27 = vadd.f32 0.2548296, %v2737_v24 }
 0x893   : > { %v2752_v28 = vmul.f32 %v3460_v26, %v2742_v25  ;;  %v2741_v29 = vmul.f32 %v3458_v11, %v2739_v27 }
 0x895   : > { %v2754_v31 = vsub.f32 1.0, %v2752_v28  ;;  %v2751_v34 = vmul.f32 %v3462_v30, %v2741_v29 }
 0x897   : > { %v2756_v35 = vmul.f32 %v2754_v31, %v2714_v33  ;;  %v2753_v36 = vsub.f32 1.0, %v2751_v34 }
 0x899   : > { %v2755_v38 = vmul.f32 %v2753_v36, %v2713_v37  ;;  %v2758_v39 = vadd.f32 1.0, %v2756_v35 }
 0x89b   : > { %v2757_v41 = vadd.f32 1.0, %v2755_v38  ;;  %v2760_v44 = vmul.f32 %v2758_v39, %v2708_v42 }
 0x89d   : > { %v2759_v43 = vmul.f32 %v2757_v41, %v2707_v40 }
 0x89f   : > { %3343 = vmatprep.mubr.msk.f32.mxu1 %vm2776_vm6, %v2759_v43 }
 0x8a0   : > { %3344 = vmatmul.mubr.msk.f32.vlgmr.msra.gmra.mxu1 %vm2776_vm6, %v2760_v44 }
 0x960   : > { %v3345_v46 = vpop.f32.mrf.mxu1 }
 0x961   : > { %v2855_v47 = vadd.f32 %v3345_v46, %v3094_v45 }
 0x962   : > { %v2849_v48 = vpop.f32.mrf.mxu1 }
 0x963   : > { %v2859_v49 = vadd.f32 %v2855_v47, %v3995_v12  ;;  %v2850_v50 = vadd.f32 %v3094_v45, %v2849_v48 }
 0x965   : > { %2861 = vst.msk [vmem:[#allocation7 + $0x8] sm:$0xff] %vm606_vm1, %v2859_v49  ;;  %v2858_v51 = vadd.f32 %v2850_v50, %v3998_v14 }
 0x967   : > { %2860 = vst.msk [vmem:[#allocation7] sm:$0xff] %vm606_vm1, %v2858_v51 }
 0x968   : > { %3530 = shalt.err (!%p3527_p2)
}
 0x969   : > { %s3598_s9 = smov 128   ;;  %s3599_s12 = smov 8  }
 0x96a   : > { %s4120_s16 = sld [smem:[#allocation20_spill]] }
 0x970   : > { %3353 = dma.vmem_to_hbm [thread:$0]  (%p3367_p8), %s2869_s30, 256, %s4120_s16, [#allocation4], %s3598_s9, %s3598_s9, %s3599_s12  }
 0x971   : > { %3566 = dma.done.wait (%p3367_p8), [#allocation4], 256  }
 0x972   : > { %3568 = vsyncadd (%p3367_p8), [#allocation4], 4294967040 }
 0x973 PF: > { %s4121_s24 = sld [smem:[#allocation11_spill]]  ;;  %s4123_s21 = smov %s3575_s22 }
 0x974   : > { %s4122_s27 = sld [smem:[#allocation12_spill]]  ;;  %s4124_s22 = smov %s3579_s23 }
 0x979   : > { %p24_p3 = scmp.ge.s32.totalorder %s4121_s24, 4  }
 0x97a   : > { %s4125_s23 = smov %s4122_s27 }
 0x97b   :  { %26 = sbr.rel (!%p24_p3) target bundleno = 14 (0xe), region = 144 }
 0x980   :  { %2884 = vsyncpa [#allocation3], 1 }
 0x981   :  { %2886 = vsyncpa [#allocation3 + $0x1], 1 }
 0x982   :  { %2887 = vsyncpa [#allocation6], 1 }
 0x983   :  { %2889 = vsyncpa [#allocation6 + $0x1], 1 }
 0x984   :  { %2890 = vsyncpa [#allocation4], 1 }
 0x985   :  { %2892 = vsyncpa [#allocation4 + $0x1], 1 }

</bundles_post_ra>
